<compile_context>
chip_gen: v7x
topology: tpu7x:2x2x1
jax: 0.10.0
libtpu: 0.0.40
codegen_flags: <defaults>
</compile_context>

<pallas_src>
import numpy as np
import jax
import jax.numpy as jnp
from jax.experimental import pallas as pl
from jax.experimental.pallas import tpu as pltpu

LOG10 = float(np.log(10.0))
LN_EPS = 1e-5
N_PARAMS = 46          # 3 MLPs * (3 layers * 4 tensors) + 4 GRU tensors + 3 heads * 2


# ----------------------------- parameter packing -----------------------------
def pack_params(params, H, L, P, F, DP):
    """Pack the 46 raw tensors into 11 kernel inputs (fused / lane-padded)."""
    f32 = jnp.float32
    zHH = jnp.zeros((H, H), f32)

    # layer-1 weights of the two input MLPs, lane-concatenated  (1, 2H)
    w1_cat = jnp.concatenate([params[0], params[12]], axis=1)

    # layer 2/3 block-diagonal fused weights of the two input MLPs  (2, 2H, 2H)
    def bdiag(a, b):
        return jnp.concatenate(
            [jnp.concatenate([a, zHH], axis=1),
             jnp.concatenate([zHH, b], axis=1)], axis=0)

    wsq_in = jnp.stack([bdiag(params[4], params[16]),
                        bdiag(params[8], params[20])], axis=0)

    # (bias, gamma, beta) rows per layer, f0-half | lo-half  -> (9, 2H)
    rows = []
    for l in range(3):
        for o in (1, 2, 3):
            rows.append(jnp.concatenate([params[4 * l + o],
                                         params[12 + 4 * l + o]], axis=1))
    vec_in = jnp.concatenate(rows, axis=0)

    # fi_MLP
    wsq_fi = jnp.stack([params[28], params[32], params[36]], axis=0)      # (3, H, H)
    vec_fi = jnp.concatenate([params[28 + 4 * l + o]
                              for l in range(3) for o in (1, 2, 3)], axis=0)  # (9, H)

    # GRU
    wih = params[24]                                                      # (2H+L, 3H)
    wih_a, wih_z = wih[:2 * H, :], wih[2 * H:, :]
    whh = params[25]                                                      # (H, 3H)
    b_ih, b_hh = params[26], params[27]
    # fold the r/z slices of b_hh into b_ih (they sit outside the r-gated term)
    fold = jnp.concatenate([b_hh[:, :2 * H], jnp.zeros((1, H), f32)], axis=1)
    gru_bias = jnp.concatenate([b_ih + fold, b_hh], axis=0)               # (2, 3H)

    # fused, lane-padded head: columns = [amp | alpha (P) | filter (F) | 0-pad]
    d_out = 1 + P + F
    head_w = jnp.concatenate([params[40], params[42], params[44]], axis=1)
    head_w = jnp.pad(head_w, ((0, 0), (0, DP - d_out)))                   # (H, DP)
    head_b = jnp.concatenate([params[41], params[43], params[45]], axis=1)
    head_b = jnp.pad(head_b, ((0, 0), (0, DP - d_out)))                   # (1, DP)

    return (w1_cat, wsq_in, vec_in, wsq_fi, vec_fi,
            wih_a, wih_z, whh, gru_bias, head_w, head_b)


# --------------------------------- kernel ------------------------------------
def make_kernel(*, B, TILE_T, H, L, P):
    R = TILE_T * B      # rows per time tile (time-major: row = t * B + b)

    def ln_relu(x, g, b):
        mu = jnp.mean(x, axis=-1, keepdims=True)
        var = jnp.mean(jnp.square(x - mu), axis=-1, keepdims=True)
        return jnp.maximum((x - mu) * jax.lax.rsqrt(var + LN_EPS) * g + b, 0.0)

    def kernel(inp_ref, w1_ref, wsq_in_ref, vec_in_ref, wsq_fi_ref, vec_fi_ref,
               wih_a_ref, wih_z_ref, whh_ref, gbias_ref, head_w_ref, head_b_ref,
               out_ref, h_ref, gru_scr):
        t = pl.program_id(0)

        @pl.when(t == 0)
        def _():
            h_ref[...] = jnp.zeros_like(h_ref)

        inp = inp_ref[...]                       # (R, 2+L)  lanes: [f0 | lo | z]
        cond = inp[:, 0:2]
        zlat = inp[:, 2:2 + L]

        vin = vec_in_ref[...]                    # (9, 2H)
        lane2h = jax.lax.broadcasted_iota(jnp.int32, (1, 2 * H), 1)
        gmask = lane2h < H                       # True on the f0 half

        def dual_ln_relu(x, g, b):
            # two independent H-lane LayerNorms evaluated on the fused (R, 2H) slab
            xa = jnp.where(gmask, x, 0.0)
            xb = x - xa
            mu = jnp.where(gmask,
                           jnp.sum(xa, -1, keepdims=True),
                           jnp.sum(xb, -1, keepdims=True)) * (1.0 / H)
            xc = x - mu
            ca = jnp.where(gmask, xc, 0.0)
            cb = xc - ca
            var = jnp.where(gmask,
                            jnp.sum(ca * ca, -1, keepdims=True),
                            jnp.sum(cb * cb, -1, keepdims=True)) * (1.0 / H)
            return jnp.maximum(xc * jax.lax.rsqrt(var + LN_EPS) * g + b, 0.0)

        # ---- fused f0/lo MLP: layer 1 exact VPU mul, layers 2/3 block-diag ----
        x = jnp.where(gmask, cond[:, 0:1], cond[:, 1:2]) * w1_ref[...] + vin[0:1, :]
        x = dual_ln_relu(x, vin[1:2, :], vin[2:3, :])
        for li in range(2):
            x = jnp.dot(x, wsq_in_ref[li],
                        preferred_element_type=jnp.float32) + vin[3 + 3 * li:4 + 3 * li, :]
            x = dual_ln_relu(x, vin[4 + 3 * li:5 + 3 * li, :],
                             vin[5 + 3 * li:6 + 3 * li, :])

        # ---- GRU input projection for the tile (packed [f0h|loh] + z) ----
        gbias = gbias_ref[...]                   # (2, 3H)
        xp_tile = (jnp.dot(x, wih_a_ref[...], preferred_element_type=jnp.float32)
                   + jnp.dot(zlat, wih_z_ref[...], preferred_element_type=jnp.float32)
                   + gbias[0:1, :])              # (R, 3H)

        whh = whh_ref[...]                       # (H, 3H)
        bhh_n = jnp.broadcast_to(gbias[1:2, 2 * H:3 * H], (B, H))   # hoisted

        # ---- serial GRU over the TILE_T steps of this tile ----
        h = h_ref[...]                           # (B, H) carried across grid steps
        for s in range(TILE_T):
            xp = xp_tile[s * B:(s + 1) * B, :]   # (B, 3H) static slice
            hp = jnp.dot(h, whh, preferred_element_type=jnp.float32)
            r = jax.nn.sigmoid(xp[:, 0:H] + hp[:, 0:H])
            zg = jax.nn.sigmoid(xp[:, H:2 * H] + hp[:, H:2 * H])
            n = jnp.tanh(xp[:, 2 * H:] + r * (hp[:, 2 * H:] + bhh_n))
            h = (1.0 - zg) * n + zg * h
            gru_scr[s * B:(s + 1) * B, :] = h    # per-step direct store (no concat)
        h_ref[...] = h
        # every row of gru_scr is rewritten above, so no stale-scratch leakage.

        # ---- fi_MLP on the tile ----
        vfi = vec_fi_ref[...]                    # (9, H)
        x = gru_scr[...]                         # (R, H)
        for li in range(3):
            x = jnp.dot(x, wsq_fi_ref[li],
                        preferred_element_type=jnp.float32) + vfi[3 * li:3 * li + 1, :]
            x = ln_relu(x, vfi[3 * li + 1:3 * li + 2, :], vfi[3 * li + 2:3 * li + 3, :])

        # ---- fused lane-dense heads + mod_sigmoid + alpha normalization ----
        head = jnp.dot(x, head_w_ref[...],
                       preferred_element_type=jnp.float32) + head_b_ref[...]
        head = 2.0 * jnp.power(jax.nn.sigmoid(head), LOG10) + 1e-7
        lane = jax.lax.broadcasted_iota(jnp.int32, head.shape, 1)
        amask = (lane >= 1) & (lane < 1 + P)
        asum = jnp.sum(jnp.where(amask, head, 0.0), axis=-1, keepdims=True)
        inv = pl.reciprocal(asum, approx=True)
        inv = inv * (2.0 - asum * inv)           # one Newton step -> ~f32 accuracy
        # NOTE: lanes >= 1+P+F contain mod_sigmoid(bias-pad) garbage; the wrapper
        # slices them off -- nothing downstream may read out[..., d_out:].
        out_ref[...] = jnp.where(amask, head * inv, head)

    return kernel


# -------------------------------- wrapper ------------------------------------
def _pick_tile_t(T, B, max_steps=16, max_rows=256):
    """Largest time tile with sublane-aligned rows, bounded unroll / VMEM."""
    cand = [d for d in range(1, T + 1)
            if T % d == 0 and ((d * B) % 8 == 0 or d == T)]
    good = [d for d in cand if d <= max_steps and d * B <= max_rows]
    if good:
        return max(good)
    return min(cand)


def decoder_forward(f0, lo, z, params, tile_t=None):
    """f0, lo: (B, T, 1); z: (B, latent, T) (PyTorch convention)."""
    B, T, _ = f0.shape
    L = z.shape[1]
    H = params[25].shape[0]            # Whh_T is (H, 3H)
    P = params[42].shape[1]
    F = params[44].shape[1]
    d_out = 1 + P + F
    DP = pl.cdiv(d_out, 128) * 128     # lane-dense (padded) fused-head width

    if tile_t is None:
        tile_t = _pick_tile_t(T, B)
    assert T % tile_t == 0
    rows = tile_t * B
    assert rows % 8 == 0 or tile_t == T, "time tile rows must be sublane aligned"
    N = T * B

    packed = pack_params(params, H, L, P, F, DP)

    # single packed conditioning stream, time-major: row index = t * B + b
    inp = jnp.concatenate([f0, lo, jnp.transpose(z, (0, 2, 1))], axis=-1)  # (B,T,2+L)
    inp = jnp.transpose(inp, (1, 0, 2)).reshape(N, 2 + L)

    kernel = make_kernel(B=B, TILE_T=tile_t, H=H, L=L, P=P)

    def _resident(a):                   # full-array block, constant index_map
        nd = a.ndim
        return pl.BlockSpec(a.shape, lambda i, _nd=nd: (0,) * _nd)

    out = pl.pallas_call(
        kernel,
        out_shape=jax.ShapeDtypeStruct((N, DP), jnp.float32),
        grid_spec=pltpu.PrefetchScalarGridSpec(
            num_scalar_prefetch=0,
            grid=(T // tile_t,),                                    # time tiles
            in_specs=[pl.BlockSpec((rows, 2 + L), lambda i: (i, 0))]
                     + [_resident(a) for a in packed],
            out_specs=pl.BlockSpec((rows, DP), lambda i: (i, 0)),
            scratch_shapes=[
                pltpu.VMEM((B, H), jnp.float32),        # GRU hidden-state carry
                pltpu.VMEM((rows, H), jnp.float32),     # per-tile GRU outputs
            ],
        ),
        compiler_params=pltpu.CompilerParams(
            dimension_semantics=("arbitrary",)),        # serial (hidden-state carry)
    )(inp, *packed)

    out = jnp.transpose(out.reshape(T, B, DP), (1, 0, 2))           # (B, T, DP)
    amp = out[..., 0:1]
    alpha = out[..., 1:1 + P]                                       # already normalized
    filt = out[..., 1 + P:1 + P + F]
    return amp, alpha, filt


# ------------------------- deterministic parameter init -------------------------
def init_params(key, H, L, P, F):
    keys = iter(jax.random.split(key, 128))

    def nrm(shape, scale):
        return scale * jax.random.normal(next(keys), shape, jnp.float32)

    def mlp_params(in_size):
        p = []
        for (i_s, o_s) in [(in_size, H), (H, H), (H, H)]:
            p.append(nrm((i_s, o_s), 1.0 / np.sqrt(i_s)))       # W^T  (in, out)
            p.append(nrm((1, o_s), 0.1))                         # bias
            p.append(1.0 + nrm((1, o_s), 0.05))                  # LN gamma
            p.append(nrm((1, o_s), 0.05))                        # LN beta
        return p

    params = []
    params += mlp_params(1)                                      # f0_MLP
    params += mlp_params(1)                                      # lo_MLP
    gin = 2 * H + L
    params.append(nrm((gin, 3 * H), 1.0 / np.sqrt(gin)))          # W_ih^T
    params.append(nrm((H, 3 * H), 1.0 / np.sqrt(H)))              # W_hh^T
    params.append(nrm((1, 3 * H), 0.1))                           # b_ih
    params.append(nrm((1, 3 * H), 0.1))                           # b_hh
    params += mlp_params(H)                                       # fi_MLP
    for o_s in (1, P, F):                                         # amp / alpha / filter heads
        params.append(nrm((H, o_s), 1.0 / np.sqrt(H)))
        params.append(nrm((1, o_s), 0.1))
    assert len(params) == N_PARAMS
    return params


# ------------------------------ pure-JAX reference ------------------------------
def ref_forward(f0, lo, z, params):
    H = params[25].shape[0]

    def mlp(x, p):
        for i in range(3):
            wt, b, g, be = p[4 * i], p[4 * i + 1], p[4 * i + 2], p[4 * i + 3]
            x = x @ wt + b
            mu = jnp.mean(x, -1, keepdims=True)
            var = jnp.mean((x - mu) ** 2, -1, keepdims=True)
            x = (x - mu) / jnp.sqrt(var + LN_EPS) * g + be
            x = jax.nn.relu(x)
        return x

    f0h = mlp(f0, params[0:12])
    loh = mlp(lo, params[12:24])
    zt = jnp.transpose(z, (0, 2, 1))
    cat = jnp.concatenate([f0h, loh, zt], -1)

    wih, whh, bih, bhh = params[24:28]
    xproj = cat @ wih + bih                    # (B, T, 3H)

    def step(h, xp):
        hp = h @ whh + bhh
        r = jax.nn.sigmoid(xp[:, :H] + hp[:, :H])
        zg = jax.nn.sigmoid(xp[:, H:2 * H] + hp[:, H:2 * H])
        n = jnp.tanh(xp[:, 2 * H:] + r * hp[:, 2 * H:])
        hn = (1.0 - zg) * n + zg * h
        return hn, hn

    h0 = jnp.zeros((f0.shape[0], H), jnp.float32)
    _, hs = jax.lax.scan(step, h0, jnp.transpose(xproj, (1, 0, 2)))
    gru_out = jnp.transpose(hs, (1, 0, 2))

    x = mlp(gru_out, params[28:40])

    def ms(v):
        return 2.0 * jax.nn.sigmoid(v) ** LOG10 + 1e-7

    amp = ms(x @ params[40] + params[41])
    alpha = ms(x @ params[42] + params[43])
    filt = ms(x @ params[44] + params[45])
    alpha = alpha / jnp.sum(alpha, -1, keepdims=True)
    return amp, alpha, filt


if __name__ == "__main__":
    B, T = 2, 8
    H = 32            # hidden_size
    P = 8             # n_partial
    FILTER_SIZE = 64  # -> filter head outputs filter_size // 2 + 1 = 33
    F = FILTER_SIZE // 2 + 1
    L = 16            # latent_size

    key = jax.random.PRNGKey(0)
    k_f0, k_lo, k_z, k_p = jax.random.split(key, 4)

    f0 = jax.random.normal(k_f0, (B, T, 1), jnp.float32)
    lo = jax.random.normal(k_lo, (B, T, 1), jnp.float32)
    z = jax.random.normal(k_z, (B, L, T), jnp.float32)   # PyTorch layout (B, latent, T)

    params = init_params(k_p, H, L, P, F)

    fwd = jax.jit(decoder_forward, static_argnames=("tile_t",))
    # tile_t=4 -> grid=(2,): exercises the hidden-state carry across grid steps.
    amp, alpha, filt = fwd(f0, lo, z, params, tile_t=4)
    jax.block_until_ready((amp, alpha, filt))

    amp_r, alpha_r, filt_r = ref_forward(f0, lo, z, params)
    np.testing.assert_allclose(np.asarray(amp), np.asarray(amp_r), rtol=2e-3, atol=1e-4)
    np.testing.assert_allclose(np.asarray(alpha), np.asarray(alpha_r), rtol=2e-3, atol=1e-4)
    np.testing.assert_allclose(np.asarray(filt), np.asarray(filt_r), rtol=2e-3, atol=1e-4)

    print("KERNEL_OK")
</pallas_src>

<mosaic_0001>
module attributes {stable_mosaic.version = 11 : i64} {
  func.func @kernel(%arg0: i32, %arg1: memref<8x18xf32, #tpu.memory_space<vmem>>, %arg2: memref<1x64xf32, #tpu.memory_space<vmem>>, %arg3: memref<2x64x64xf32, #tpu.memory_space<vmem>>, %arg4: memref<9x64xf32, #tpu.memory_space<vmem>>, %arg5: memref<3x32x32xf32, #tpu.memory_space<vmem>>, %arg6: memref<9x32xf32, #tpu.memory_space<vmem>>, %arg7: memref<64x96xf32, #tpu.memory_space<vmem>>, %arg8: memref<16x96xf32, #tpu.memory_space<vmem>>, %arg9: memref<32x96xf32, #tpu.memory_space<vmem>>, %arg10: memref<2x96xf32, #tpu.memory_space<vmem>>, %arg11: memref<32x128xf32, #tpu.memory_space<vmem>>, %arg12: memref<1x128xf32, #tpu.memory_space<vmem>>, %arg13: memref<8x128xf32, #tpu.memory_space<vmem>>, %arg14: memref<2x32xf32, #tpu.memory_space<vmem>>, %arg15: memref<8x32xf32, #tpu.memory_space<vmem>>) attributes {dimension_semantics = [#tpu.dimension_semantics<arbitrary>], iteration_bounds = array<i64: 2>, scalar_prefetch = 0 : i64, scratch_operands = 2 : i64, tpu.core_type = #tpu.core_type<tc>, window_params = [{transform_indices = @transform_0, window_bounds = array<i64: 8, 18>}, {pipeline_mode = #tpu.pipeline_mode<synchronous>, transform_indices = @transform_1, window_bounds = array<i64: 1, 64>}, {pipeline_mode = #tpu.pipeline_mode<synchronous>, transform_indices = @transform_2, window_bounds = array<i64: 2, 64, 64>}, {pipeline_mode = #tpu.pipeline_mode<synchronous>, transform_indices = @transform_3, window_bounds = array<i64: 9, 64>}, {pipeline_mode = #tpu.pipeline_mode<synchronous>, transform_indices = @transform_4, window_bounds = array<i64: 3, 32, 32>}, {pipeline_mode = #tpu.pipeline_mode<synchronous>, transform_indices = @transform_5, window_bounds = array<i64: 9, 32>}, {pipeline_mode = #tpu.pipeline_mode<synchronous>, transform_indices = @transform_6, window_bounds = array<i64: 64, 96>}, {pipeline_mode = #tpu.pipeline_mode<synchronous>, transform_indices = @transform_7, window_bounds = array<i64: 16, 96>}, {pipeline_mode = #tpu.pipeline_mode<synchronous>, transform_indices = @transform_8, window_bounds = array<i64: 32, 96>}, {pipeline_mode = #tpu.pipeline_mode<synchronous>, transform_indices = @transform_9, window_bounds = array<i64: 2, 96>}, {pipeline_mode = #tpu.pipeline_mode<synchronous>, transform_indices = @transform_10, window_bounds = array<i64: 32, 128>}, {pipeline_mode = #tpu.pipeline_mode<synchronous>, transform_indices = @transform_11, window_bounds = array<i64: 1, 128>}, {transform_indices = @transform_12, window_bounds = array<i64: 8, 128>}]} {
    %c0_i32 = arith.constant 0 : i32
    %0 = arith.cmpi eq, %arg0, %c0_i32 : i32
    %1 = arith.extui %0 : i1 to i32
    %c0_i32_0 = arith.constant 0 : i32
    %2 = arith.cmpi ne, %1, %c0_i32_0 : i32
    scf.if %2 {
      %cst_125 = arith.constant 0.000000e+00 : f32
      %458 = vector.broadcast %cst_125 : f32 to vector<2x32xf32>
      %c0_126 = arith.constant 0 : index
      %c0_127 = arith.constant 0 : index
      %459 = vector.load %arg14[%c0_126, %c0_127] : memref<2x32xf32, #tpu.memory_space<vmem>>, vector<2x32xf32>
      tpu.vector_store %arg14[%c0_126, %c0_127], %458 {strides = array<i32>} : memref<2x32xf32, #tpu.memory_space<vmem>>, vector<2x32xf32>,
    } else {
    }
    %c0 = arith.constant 0 : index
    %c0_1 = arith.constant 0 : index
    %3 = vector.load %arg1[%c0, %c0_1] : memref<8x18xf32, #tpu.memory_space<vmem>>, vector<8x18xf32>
    %4 = vector.extract_strided_slice %3 {offsets = [0, 0], sizes = [8, 2], strides = [1, 1]} : vector<8x18xf32> to vector<8x2xf32>
    %5 = vector.extract_strided_slice %3 {offsets = [0, 2], sizes = [8, 16], strides = [1, 1]} : vector<8x18xf32> to vector<8x16xf32>
    %c0_2 = arith.constant 0 : index
    %c0_3 = arith.constant 0 : index
    %6 = vector.load %arg4[%c0_2, %c0_3] : memref<9x64xf32, #tpu.memory_space<vmem>>, vector<9x64xf32>
    %7 = tpu.iota {dimensions = array<i32: 1>} : vector<1x64xi32>
    %c32_i32 = arith.constant 32 : i32
    %8 = vector.broadcast %c32_i32 : i32 to vector<1x64xi32>
    %9 = arith.cmpi slt, %7, %8 : vector<1x64xi32>
    %10 = vector.extract_strided_slice %4 {offsets = [0, 0], sizes = [8, 1], strides = [1, 1]} : vector<8x2xf32> to vector<8x1xf32>
    %11 = vector.extract_strided_slice %4 {offsets = [0, 1], sizes = [8, 1], strides = [1, 1]} : vector<8x2xf32> to vector<8x1xf32>
    %12 = vector.shape_cast %9 : vector<1x64xi1> to vector<1x64xi1>
    %13 = vector.broadcast %12 : vector<1x64xi1> to vector<8x64xi1>
    %14 = vector.shape_cast %10 : vector<8x1xf32> to vector<8x1xf32>
    %15 = vector.broadcast %14 : vector<8x1xf32> to vector<8x64xf32>
    %16 = vector.shape_cast %11 : vector<8x1xf32> to vector<8x1xf32>
    %17 = vector.broadcast %16 : vector<8x1xf32> to vector<8x64xf32>
    %18 = arith.select %13, %15, %17 : vector<8x64xi1>, vector<8x64xf32>
    %c0_4 = arith.constant 0 : index
    %c0_5 = arith.constant 0 : index
    %19 = vector.load %arg2[%c0_4, %c0_5] : memref<1x64xf32, #tpu.memory_space<vmem>>, vector<1x64xf32>
    %20 = vector.broadcast %19 : vector<1x64xf32> to vector<8x64xf32>
    %21 = arith.mulf %18, %20 : vector<8x64xf32>
    %22 = vector.extract_strided_slice %6 {offsets = [0, 0], sizes = [1, 64], strides = [1, 1]} : vector<9x64xf32> to vector<1x64xf32>
    %23 = vector.broadcast %22 : vector<1x64xf32> to vector<8x64xf32>
    %24 = arith.addf %21, %23 : vector<8x64xf32>
    %25 = vector.extract_strided_slice %6 {offsets = [1, 0], sizes = [1, 64], strides = [1, 1]} : vector<9x64xf32> to vector<1x64xf32>
    %26 = vector.extract_strided_slice %6 {offsets = [2, 0], sizes = [1, 64], strides = [1, 1]} : vector<9x64xf32> to vector<1x64xf32>
    %cst = arith.constant 0.000000e+00 : f32
    %27 = vector.shape_cast %9 : vector<1x64xi1> to vector<1x64xi1>
    %28 = vector.broadcast %27 : vector<1x64xi1> to vector<8x64xi1>
    %29 = vector.broadcast %cst : f32 to vector<8x64xf32>
    %30 = arith.select %28, %24, %29 : vector<8x64xi1>, vector<8x64xf32>
    %31 = arith.subf %24, %30 : vector<8x64xf32>
    %cst_6 = arith.constant dense<0.000000e+00> : vector<8xf32>
    %32 = vector.multi_reduction <add>, %30, %cst_6 [1] : vector<8x64xf32> to vector<8xf32>
    %33 = vector.shape_cast %32 : vector<8xf32> to vector<8x1xf32>
    %cst_7 = arith.constant dense<0.000000e+00> : vector<8xf32>
    %34 = vector.multi_reduction <add>, %31, %cst_7 [1] : vector<8x64xf32> to vector<8xf32>
    %35 = vector.shape_cast %34 : vector<8xf32> to vector<8x1xf32>
    %36 = vector.shape_cast %9 : vector<1x64xi1> to vector<1x64xi1>
    %37 = vector.broadcast %36 : vector<1x64xi1> to vector<8x64xi1>
    %38 = vector.shape_cast %33 : vector<8x1xf32> to vector<8x1xf32>
    %39 = vector.broadcast %38 : vector<8x1xf32> to vector<8x64xf32>
    %40 = vector.shape_cast %35 : vector<8x1xf32> to vector<8x1xf32>
    %41 = vector.broadcast %40 : vector<8x1xf32> to vector<8x64xf32>
    %42 = arith.select %37, %39, %41 : vector<8x64xi1>, vector<8x64xf32>
    %cst_8 = arith.constant 3.125000e-02 : f32
    %43 = vector.broadcast %cst_8 : f32 to vector<8x64xf32>
    %44 = arith.mulf %42, %43 : vector<8x64xf32>
    %45 = arith.subf %24, %44 : vector<8x64xf32>
    %cst_9 = arith.constant 0.000000e+00 : f32
    %46 = vector.shape_cast %9 : vector<1x64xi1> to vector<1x64xi1>
    %47 = vector.broadcast %46 : vector<1x64xi1> to vector<8x64xi1>
    %48 = vector.broadcast %cst_9 : f32 to vector<8x64xf32>
    %49 = arith.select %47, %45, %48 : vector<8x64xi1>, vector<8x64xf32>
    %50 = arith.subf %45, %49 : vector<8x64xf32>
    %51 = arith.mulf %49, %49 : vector<8x64xf32>
    %cst_10 = arith.constant dense<0.000000e+00> : vector<8xf32>
    %52 = vector.multi_reduction <add>, %51, %cst_10 [1] : vector<8x64xf32> to vector<8xf32>
    %53 = vector.shape_cast %52 : vector<8xf32> to vector<8x1xf32>
    %54 = arith.mulf %50, %50 : vector<8x64xf32>
    %cst_11 = arith.constant dense<0.000000e+00> : vector<8xf32>
    %55 = vector.multi_reduction <add>, %54, %cst_11 [1] : vector<8x64xf32> to vector<8xf32>
    %56 = vector.shape_cast %55 : vector<8xf32> to vector<8x1xf32>
    %57 = vector.shape_cast %9 : vector<1x64xi1> to vector<1x64xi1>
    %58 = vector.broadcast %57 : vector<1x64xi1> to vector<8x64xi1>
    %59 = vector.shape_cast %53 : vector<8x1xf32> to vector<8x1xf32>
    %60 = vector.broadcast %59 : vector<8x1xf32> to vector<8x64xf32>
    %61 = vector.shape_cast %56 : vector<8x1xf32> to vector<8x1xf32>
    %62 = vector.broadcast %61 : vector<8x1xf32> to vector<8x64xf32>
    %63 = arith.select %58, %60, %62 : vector<8x64xi1>, vector<8x64xf32>
    %cst_12 = arith.constant 3.125000e-02 : f32
    %64 = vector.broadcast %cst_12 : f32 to vector<8x64xf32>
    %65 = arith.mulf %63, %64 : vector<8x64xf32>
    %cst_13 = arith.constant 9.99999974E-6 : f32
    %66 = vector.broadcast %cst_13 : f32 to vector<8x64xf32>
    %67 = arith.addf %65, %66 : vector<8x64xf32>
    %68 = math.rsqrt %67 : vector<8x64xf32>
    %69 = arith.mulf %45, %68 : vector<8x64xf32>
    %70 = vector.broadcast %25 : vector<1x64xf32> to vector<8x64xf32>
    %71 = arith.mulf %69, %70 : vector<8x64xf32>
    %72 = vector.broadcast %26 : vector<1x64xf32> to vector<8x64xf32>
    %73 = arith.addf %71, %72 : vector<8x64xf32>
    %cst_14 = arith.constant 0.000000e+00 : f32
    %74 = vector.broadcast %cst_14 : f32 to vector<8x64xf32>
    %75 = arith.maximumf %73, %74 : vector<8x64xf32>
    %c0_15 = arith.constant 0 : index
    %c0_16 = arith.constant 0 : index
    %c0_17 = arith.constant 0 : index
    %76 = vector.load %arg3[%c0_15, %c0_16, %c0_17] : memref<2x64x64xf32, #tpu.memory_space<vmem>>, vector<1x64x64xf32>
    %77 = vector.shape_cast %76 : vector<1x64x64xf32> to vector<64x64xf32>
    %cst_18 = arith.constant dense<0.000000e+00> : vector<8x64xf32>
    %78 = tpu.matmul %75, %77, %cst_18 {dimension_numbers = #tpu.dot_dimension_numbers<[1], [0], [0], [1], [0, 0, 1, 1], [], []>} : vector<8x64xf32>, vector<64x64xf32>, vector<8x64xf32> -> vector<8x64xf32>
    %79 = vector.extract_strided_slice %6 {offsets = [3, 0], sizes = [1, 64], strides = [1, 1]} : vector<9x64xf32> to vector<1x64xf32>
    %80 = vector.broadcast %79 : vector<1x64xf32> to vector<8x64xf32>
    %81 = arith.addf %78, %80 : vector<8x64xf32>
    %82 = vector.extract_strided_slice %6 {offsets = [4, 0], sizes = [1, 64], strides = [1, 1]} : vector<9x64xf32> to vector<1x64xf32>
    %83 = vector.extract_strided_slice %6 {offsets = [5, 0], sizes = [1, 64], strides = [1, 1]} : vector<9x64xf32> to vector<1x64xf32>
    %cst_19 = arith.constant 0.000000e+00 : f32
    %84 = vector.shape_cast %9 : vector<1x64xi1> to vector<1x64xi1>
    %85 = vector.broadcast %84 : vector<1x64xi1> to vector<8x64xi1>
    %86 = vector.broadcast %cst_19 : f32 to vector<8x64xf32>
    %87 = arith.select %85, %81, %86 : vector<8x64xi1>, vector<8x64xf32>
    %88 = arith.subf %81, %87 : vector<8x64xf32>
    %cst_20 = arith.constant dense<0.000000e+00> : vector<8xf32>
    %89 = vector.multi_reduction <add>, %87, %cst_20 [1] : vector<8x64xf32> to vector<8xf32>
    %90 = vector.shape_cast %89 : vector<8xf32> to vector<8x1xf32>
    %cst_21 = arith.constant dense<0.000000e+00> : vector<8xf32>
    %91 = vector.multi_reduction <add>, %88, %cst_21 [1] : vector<8x64xf32> to vector<8xf32>
    %92 = vector.shape_cast %91 : vector<8xf32> to vector<8x1xf32>
    %93 = vector.shape_cast %9 : vector<1x64xi1> to vector<1x64xi1>
    %94 = vector.broadcast %93 : vector<1x64xi1> to vector<8x64xi1>
    %95 = vector.shape_cast %90 : vector<8x1xf32> to vector<8x1xf32>
    %96 = vector.broadcast %95 : vector<8x1xf32> to vector<8x64xf32>
    %97 = vector.shape_cast %92 : vector<8x1xf32> to vector<8x1xf32>
    %98 = vector.broadcast %97 : vector<8x1xf32> to vector<8x64xf32>
    %99 = arith.select %94, %96, %98 : vector<8x64xi1>, vector<8x64xf32>
    %cst_22 = arith.constant 3.125000e-02 : f32
    %100 = vector.broadcast %cst_22 : f32 to vector<8x64xf32>
    %101 = arith.mulf %99, %100 : vector<8x64xf32>
    %102 = arith.subf %81, %101 : vector<8x64xf32>
    %cst_23 = arith.constant 0.000000e+00 : f32
    %103 = vector.shape_cast %9 : vector<1x64xi1> to vector<1x64xi1>
    %104 = vector.broadcast %103 : vector<1x64xi1> to vector<8x64xi1>
    %105 = vector.broadcast %cst_23 : f32 to vector<8x64xf32>
    %106 = arith.select %104, %102, %105 : vector<8x64xi1>, vector<8x64xf32>
    %107 = arith.subf %102, %106 : vector<8x64xf32>
    %108 = arith.mulf %106, %106 : vector<8x64xf32>
    %cst_24 = arith.constant dense<0.000000e+00> : vector<8xf32>
    %109 = vector.multi_reduction <add>, %108, %cst_24 [1] : vector<8x64xf32> to vector<8xf32>
    %110 = vector.shape_cast %109 : vector<8xf32> to vector<8x1xf32>
    %111 = arith.mulf %107, %107 : vector<8x64xf32>
    %cst_25 = arith.constant dense<0.000000e+00> : vector<8xf32>
    %112 = vector.multi_reduction <add>, %111, %cst_25 [1] : vector<8x64xf32> to vector<8xf32>
    %113 = vector.shape_cast %112 : vector<8xf32> to vector<8x1xf32>
    %114 = vector.shape_cast %9 : vector<1x64xi1> to vector<1x64xi1>
    %115 = vector.broadcast %114 : vector<1x64xi1> to vector<8x64xi1>
    %116 = vector.shape_cast %110 : vector<8x1xf32> to vector<8x1xf32>
    %117 = vector.broadcast %116 : vector<8x1xf32> to vector<8x64xf32>
    %118 = vector.shape_cast %113 : vector<8x1xf32> to vector<8x1xf32>
    %119 = vector.broadcast %118 : vector<8x1xf32> to vector<8x64xf32>
    %120 = arith.select %115, %117, %119 : vector<8x64xi1>, vector<8x64xf32>
    %cst_26 = arith.constant 3.125000e-02 : f32
    %121 = vector.broadcast %cst_26 : f32 to vector<8x64xf32>
    %122 = arith.mulf %120, %121 : vector<8x64xf32>
    %cst_27 = arith.constant 9.99999974E-6 : f32
    %123 = vector.broadcast %cst_27 : f32 to vector<8x64xf32>
    %124 = arith.addf %122, %123 : vector<8x64xf32>
    %125 = math.rsqrt %124 : vector<8x64xf32>
    %126 = arith.mulf %102, %125 : vector<8x64xf32>
    %127 = vector.broadcast %82 : vector<1x64xf32> to vector<8x64xf32>
    %128 = arith.mulf %126, %127 : vector<8x64xf32>
    %129 = vector.broadcast %83 : vector<1x64xf32> to vector<8x64xf32>
    %130 = arith.addf %128, %129 : vector<8x64xf32>
    %cst_28 = arith.constant 0.000000e+00 : f32
    %131 = vector.broadcast %cst_28 : f32 to vector<8x64xf32>
    %132 = arith.maximumf %130, %131 : vector<8x64xf32>
    %c1 = arith.constant 1 : index
    %c0_29 = arith.constant 0 : index
    %c0_30 = arith.constant 0 : index
    %133 = vector.load %arg3[%c1, %c0_29, %c0_30] : memref<2x64x64xf32, #tpu.memory_space<vmem>>, vector<1x64x64xf32>
    %134 = vector.shape_cast %133 : vector<1x64x64xf32> to vector<64x64xf32>
    %cst_31 = arith.constant dense<0.000000e+00> : vector<8x64xf32>
    %135 = tpu.matmul %132, %134, %cst_31 {dimension_numbers = #tpu.dot_dimension_numbers<[1], [0], [0], [1], [0, 0, 1, 1], [], []>} : vector<8x64xf32>, vector<64x64xf32>, vector<8x64xf32> -> vector<8x64xf32>
    %136 = vector.extract_strided_slice %6 {offsets = [6, 0], sizes = [1, 64], strides = [1, 1]} : vector<9x64xf32> to vector<1x64xf32>
    %137 = vector.broadcast %136 : vector<1x64xf32> to vector<8x64xf32>
    %138 = arith.addf %135, %137 : vector<8x64xf32>
    %139 = vector.extract_strided_slice %6 {offsets = [7, 0], sizes = [1, 64], strides = [1, 1]} : vector<9x64xf32> to vector<1x64xf32>
    %140 = vector.extract_strided_slice %6 {offsets = [8, 0], sizes = [1, 64], strides = [1, 1]} : vector<9x64xf32> to vector<1x64xf32>
    %cst_32 = arith.constant 0.000000e+00 : f32
    %141 = vector.shape_cast %9 : vector<1x64xi1> to vector<1x64xi1>
    %142 = vector.broadcast %141 : vector<1x64xi1> to vector<8x64xi1>
    %143 = vector.broadcast %cst_32 : f32 to vector<8x64xf32>
    %144 = arith.select %142, %138, %143 : vector<8x64xi1>, vector<8x64xf32>
    %145 = arith.subf %138, %144 : vector<8x64xf32>
    %cst_33 = arith.constant dense<0.000000e+00> : vector<8xf32>
    %146 = vector.multi_reduction <add>, %144, %cst_33 [1] : vector<8x64xf32> to vector<8xf32>
    %147 = vector.shape_cast %146 : vector<8xf32> to vector<8x1xf32>
    %cst_34 = arith.constant dense<0.000000e+00> : vector<8xf32>
    %148 = vector.multi_reduction <add>, %145, %cst_34 [1] : vector<8x64xf32> to vector<8xf32>
    %149 = vector.shape_cast %148 : vector<8xf32> to vector<8x1xf32>
    %150 = vector.shape_cast %9 : vector<1x64xi1> to vector<1x64xi1>
    %151 = vector.broadcast %150 : vector<1x64xi1> to vector<8x64xi1>
    %152 = vector.shape_cast %147 : vector<8x1xf32> to vector<8x1xf32>
    %153 = vector.broadcast %152 : vector<8x1xf32> to vector<8x64xf32>
    %154 = vector.shape_cast %149 : vector<8x1xf32> to vector<8x1xf32>
    %155 = vector.broadcast %154 : vector<8x1xf32> to vector<8x64xf32>
    %156 = arith.select %151, %153, %155 : vector<8x64xi1>, vector<8x64xf32>
    %cst_35 = arith.constant 3.125000e-02 : f32
    %157 = vector.broadcast %cst_35 : f32 to vector<8x64xf32>
    %158 = arith.mulf %156, %157 : vector<8x64xf32>
    %159 = arith.subf %138, %158 : vector<8x64xf32>
    %cst_36 = arith.constant 0.000000e+00 : f32
    %160 = vector.shape_cast %9 : vector<1x64xi1> to vector<1x64xi1>
    %161 = vector.broadcast %160 : vector<1x64xi1> to vector<8x64xi1>
    %162 = vector.broadcast %cst_36 : f32 to vector<8x64xf32>
    %163 = arith.select %161, %159, %162 : vector<8x64xi1>, vector<8x64xf32>
    %164 = arith.subf %159, %163 : vector<8x64xf32>
    %165 = arith.mulf %163, %163 : vector<8x64xf32>
    %cst_37 = arith.constant dense<0.000000e+00> : vector<8xf32>
    %166 = vector.multi_reduction <add>, %165, %cst_37 [1] : vector<8x64xf32> to vector<8xf32>
    %167 = vector.shape_cast %166 : vector<8xf32> to vector<8x1xf32>
    %168 = arith.mulf %164, %164 : vector<8x64xf32>
    %cst_38 = arith.constant dense<0.000000e+00> : vector<8xf32>
    %169 = vector.multi_reduction <add>, %168, %cst_38 [1] : vector<8x64xf32> to vector<8xf32>
    %170 = vector.shape_cast %169 : vector<8xf32> to vector<8x1xf32>
    %171 = vector.shape_cast %9 : vector<1x64xi1> to vector<1x64xi1>
    %172 = vector.broadcast %171 : vector<1x64xi1> to vector<8x64xi1>
    %173 = vector.shape_cast %167 : vector<8x1xf32> to vector<8x1xf32>
    %174 = vector.broadcast %173 : vector<8x1xf32> to vector<8x64xf32>
    %175 = vector.shape_cast %170 : vector<8x1xf32> to vector<8x1xf32>
    %176 = vector.broadcast %175 : vector<8x1xf32> to vector<8x64xf32>
    %177 = arith.select %172, %174, %176 : vector<8x64xi1>, vector<8x64xf32>
    %cst_39 = arith.constant 3.125000e-02 : f32
    %178 = vector.broadcast %cst_39 : f32 to vector<8x64xf32>
    %179 = arith.mulf %177, %178 : vector<8x64xf32>
    %cst_40 = arith.constant 9.99999974E-6 : f32
    %180 = vector.broadcast %cst_40 : f32 to vector<8x64xf32>
    %181 = arith.addf %179, %180 : vector<8x64xf32>
    %182 = math.rsqrt %181 : vector<8x64xf32>
    %183 = arith.mulf %159, %182 : vector<8x64xf32>
    %184 = vector.broadcast %139 : vector<1x64xf32> to vector<8x64xf32>
    %185 = arith.mulf %183, %184 : vector<8x64xf32>
    %186 = vector.broadcast %140 : vector<1x64xf32> to vector<8x64xf32>
    %187 = arith.addf %185, %186 : vector<8x64xf32>
    %cst_41 = arith.constant 0.000000e+00 : f32
    %188 = vector.broadcast %cst_41 : f32 to vector<8x64xf32>
    %189 = arith.maximumf %187, %188 : vector<8x64xf32>
    %c0_42 = arith.constant 0 : index
    %c0_43 = arith.constant 0 : index
    %190 = vector.load %arg10[%c0_42, %c0_43] : memref<2x96xf32, #tpu.memory_space<vmem>>, vector<2x96xf32>
    %c0_44 = arith.constant 0 : index
    %c0_45 = arith.constant 0 : index
    %191 = vector.load %arg7[%c0_44, %c0_45] : memref<64x96xf32, #tpu.memory_space<vmem>>, vector<64x96xf32>
    %cst_46 = arith.constant dense<0.000000e+00> : vector<8x96xf32>
    %192 = tpu.matmul %189, %191, %cst_46 {dimension_numbers = #tpu.dot_dimension_numbers<[1], [0], [0], [1], [0, 0, 1, 1], [], []>} : vector<8x64xf32>, vector<64x96xf32>, vector<8x96xf32> -> vector<8x96xf32>
    %c0_47 = arith.constant 0 : index
    %c0_48 = arith.constant 0 : index
    %193 = vector.load %arg8[%c0_47, %c0_48] : memref<16x96xf32, #tpu.memory_space<vmem>>, vector<16x96xf32>
    %cst_49 = arith.constant dense<0.000000e+00> : vector<8x96xf32>
    %194 = tpu.matmul %5, %193, %cst_49 {dimension_numbers = #tpu.dot_dimension_numbers<[1], [0], [0], [1], [0, 0, 1, 1], [], []>} : vector<8x16xf32>, vector<16x96xf32>, vector<8x96xf32> -> vector<8x96xf32>
    %195 = arith.addf %192, %194 : vector<8x96xf32>
    %196 = vector.extract_strided_slice %190 {offsets = [0, 0], sizes = [1, 96], strides = [1, 1]} : vector<2x96xf32> to vector<1x96xf32>
    %197 = vector.broadcast %196 : vector<1x96xf32> to vector<8x96xf32>
    %198 = arith.addf %195, %197 : vector<8x96xf32>
    %c0_50 = arith.constant 0 : index
    %c0_51 = arith.constant 0 : index
    %199 = vector.load %arg9[%c0_50, %c0_51] : memref<32x96xf32, #tpu.memory_space<vmem>>, vector<32x96xf32>
    %200 = vector.extract_strided_slice %190 {offsets = [1, 64], sizes = [1, 32], strides = [1, 1]} : vector<2x96xf32> to vector<1x32xf32>
    %201 = vector.shape_cast %200 : vector<1x32xf32> to vector<1x32xf32>
    %202 = vector.broadcast %201 : vector<1x32xf32> to vector<2x32xf32>
    %c0_52 = arith.constant 0 : index
    %c0_53 = arith.constant 0 : index
    %203 = vector.load %arg14[%c0_52, %c0_53] : memref<2x32xf32, #tpu.memory_space<vmem>>, vector<2x32xf32>
    %204 = vector.extract_strided_slice %198 {offsets = [0, 0], sizes = [2, 96], strides = [1, 1]} : vector<8x96xf32> to vector<2x96xf32>
    %cst_54 = arith.constant dense<0.000000e+00> : vector<2x96xf32>
    %205 = tpu.matmul %203, %199, %cst_54 {dimension_numbers = #tpu.dot_dimension_numbers<[1], [0], [0], [1], [0, 0, 1, 1], [], []>} : vector<2x32xf32>, vector<32x96xf32>, vector<2x96xf32> -> vector<2x96xf32>
    %206 = vector.extract_strided_slice %204 {offsets = [0, 0], sizes = [2, 32], strides = [1, 1]} : vector<2x96xf32> to vector<2x32xf32>
    %207 = vector.extract_strided_slice %205 {offsets = [0, 0], sizes = [2, 32], strides = [1, 1]} : vector<2x96xf32> to vector<2x32xf32>
    %208 = arith.addf %206, %207 : vector<2x32xf32>
    %209 = arith.negf %208 : vector<2x32xf32>
    %210 = math.exp %209 : vector<2x32xf32>
    %cst_55 = arith.constant 1.000000e+00 : f32
    %211 = vector.broadcast %cst_55 : f32 to vector<2x32xf32>
    %212 = arith.addf %211, %210 : vector<2x32xf32>
    %213 = arith.divf %211, %212 : vector<2x32xf32>
    %214 = vector.extract_strided_slice %204 {offsets = [0, 32], sizes = [2, 32], strides = [1, 1]} : vector<2x96xf32> to vector<2x32xf32>
    %215 = vector.extract_strided_slice %205 {offsets = [0, 32], sizes = [2, 32], strides = [1, 1]} : vector<2x96xf32> to vector<2x32xf32>
    %216 = arith.addf %214, %215 : vector<2x32xf32>
    %217 = arith.negf %216 : vector<2x32xf32>
    %218 = math.exp %217 : vector<2x32xf32>
    %cst_56 = arith.constant 1.000000e+00 : f32
    %219 = vector.broadcast %cst_56 : f32 to vector<2x32xf32>
    %220 = arith.addf %219, %218 : vector<2x32xf32>
    %221 = arith.divf %219, %220 : vector<2x32xf32>
    %222 = vector.extract_strided_slice %204 {offsets = [0, 64], sizes = [2, 32], strides = [1, 1]} : vector<2x96xf32> to vector<2x32xf32>
    %223 = vector.extract_strided_slice %205 {offsets = [0, 64], sizes = [2, 32], strides = [1, 1]} : vector<2x96xf32> to vector<2x32xf32>
    %224 = arith.addf %223, %202 : vector<2x32xf32>
    %225 = arith.mulf %213, %224 : vector<2x32xf32>
    %226 = arith.addf %222, %225 : vector<2x32xf32>
    %227 = math.tanh %226 : vector<2x32xf32>
    %cst_57 = arith.constant 1.000000e+00 : f32
    %228 = vector.broadcast %cst_57 : f32 to vector<2x32xf32>
    %229 = arith.subf %228, %221 : vector<2x32xf32>
    %230 = arith.mulf %229, %227 : vector<2x32xf32>
    %231 = arith.mulf %221, %203 : vector<2x32xf32>
    %232 = arith.addf %230, %231 : vector<2x32xf32>
    %c0_58 = arith.constant 0 : index
    %c0_59 = arith.constant 0 : index
    %233 = vector.load %arg15[%c0_58, %c0_59] : memref<8x32xf32, #tpu.memory_space<vmem>>, vector<2x32xf32>
    tpu.vector_store %arg15[%c0_58, %c0_59], %232 {strides = array<i32>} : memref<8x32xf32, #tpu.memory_space<vmem>>, vector<2x32xf32>,
    %234 = vector.extract_strided_slice %198 {offsets = [2, 0], sizes = [2, 96], strides = [1, 1]} : vector<8x96xf32> to vector<2x96xf32>
    %cst_60 = arith.constant dense<0.000000e+00> : vector<2x96xf32>
    %235 = tpu.matmul %232, %199, %cst_60 {dimension_numbers = #tpu.dot_dimension_numbers<[1], [0], [0], [1], [0, 0, 1, 1], [], []>} : vector<2x32xf32>, vector<32x96xf32>, vector<2x96xf32> -> vector<2x96xf32>
    %236 = vector.extract_strided_slice %234 {offsets = [0, 0], sizes = [2, 32], strides = [1, 1]} : vector<2x96xf32> to vector<2x32xf32>
    %237 = vector.extract_strided_slice %235 {offsets = [0, 0], sizes = [2, 32], strides = [1, 1]} : vector<2x96xf32> to vector<2x32xf32>
    %238 = arith.addf %236, %237 : vector<2x32xf32>
    %239 = arith.negf %238 : vector<2x32xf32>
    %240 = math.exp %239 : vector<2x32xf32>
    %cst_61 = arith.constant 1.000000e+00 : f32
    %241 = vector.broadcast %cst_61 : f32 to vector<2x32xf32>
    %242 = arith.addf %241, %240 : vector<2x32xf32>
    %243 = arith.divf %241, %242 : vector<2x32xf32>
    %244 = vector.extract_strided_slice %234 {offsets = [0, 32], sizes = [2, 32], strides = [1, 1]} : vector<2x96xf32> to vector<2x32xf32>
    %245 = vector.extract_strided_slice %235 {offsets = [0, 32], sizes = [2, 32], strides = [1, 1]} : vector<2x96xf32> to vector<2x32xf32>
    %246 = arith.addf %244, %245 : vector<2x32xf32>
    %247 = arith.negf %246 : vector<2x32xf32>
    %248 = math.exp %247 : vector<2x32xf32>
    %cst_62 = arith.constant 1.000000e+00 : f32
    %249 = vector.broadcast %cst_62 : f32 to vector<2x32xf32>
    %250 = arith.addf %249, %248 : vector<2x32xf32>
    %251 = arith.divf %249, %250 : vector<2x32xf32>
    %252 = vector.extract_strided_slice %234 {offsets = [0, 64], sizes = [2, 32], strides = [1, 1]} : vector<2x96xf32> to vector<2x32xf32>
    %253 = vector.extract_strided_slice %235 {offsets = [0, 64], sizes = [2, 32], strides = [1, 1]} : vector<2x96xf32> to vector<2x32xf32>
    %254 = arith.addf %253, %202 : vector<2x32xf32>
    %255 = arith.mulf %243, %254 : vector<2x32xf32>
    %256 = arith.addf %252, %255 : vector<2x32xf32>
    %257 = math.tanh %256 : vector<2x32xf32>
    %cst_63 = arith.constant 1.000000e+00 : f32
    %258 = vector.broadcast %cst_63 : f32 to vector<2x32xf32>
    %259 = arith.subf %258, %251 : vector<2x32xf32>
    %260 = arith.mulf %259, %257 : vector<2x32xf32>
    %261 = arith.mulf %251, %232 : vector<2x32xf32>
    %262 = arith.addf %260, %261 : vector<2x32xf32>
    %c2 = arith.constant 2 : index
    %c0_64 = arith.constant 0 : index
    %263 = vector.load %arg15[%c2, %c0_64] : memref<8x32xf32, #tpu.memory_space<vmem>>, vector<2x32xf32>
    tpu.vector_store %arg15[%c2, %c0_64], %262 {strides = array<i32>} : memref<8x32xf32, #tpu.memory_space<vmem>>, vector<2x32xf32>,
    %264 = vector.extract_strided_slice %198 {offsets = [4, 0], sizes = [2, 96], strides = [1, 1]} : vector<8x96xf32> to vector<2x96xf32>
    %cst_65 = arith.constant dense<0.000000e+00> : vector<2x96xf32>
    %265 = tpu.matmul %262, %199, %cst_65 {dimension_numbers = #tpu.dot_dimension_numbers<[1], [0], [0], [1], [0, 0, 1, 1], [], []>} : vector<2x32xf32>, vector<32x96xf32>, vector<2x96xf32> -> vector<2x96xf32>
    %266 = vector.extract_strided_slice %264 {offsets = [0, 0], sizes = [2, 32], strides = [1, 1]} : vector<2x96xf32> to vector<2x32xf32>
    %267 = vector.extract_strided_slice %265 {offsets = [0, 0], sizes = [2, 32], strides = [1, 1]} : vector<2x96xf32> to vector<2x32xf32>
    %268 = arith.addf %266, %267 : vector<2x32xf32>
    %269 = arith.negf %268 : vector<2x32xf32>
    %270 = math.exp %269 : vector<2x32xf32>
    %cst_66 = arith.constant 1.000000e+00 : f32
    %271 = vector.broadcast %cst_66 : f32 to vector<2x32xf32>
    %272 = arith.addf %271, %270 : vector<2x32xf32>
    %273 = arith.divf %271, %272 : vector<2x32xf32>
    %274 = vector.extract_strided_slice %264 {offsets = [0, 32], sizes = [2, 32], strides = [1, 1]} : vector<2x96xf32> to vector<2x32xf32>
    %275 = vector.extract_strided_slice %265 {offsets = [0, 32], sizes = [2, 32], strides = [1, 1]} : vector<2x96xf32> to vector<2x32xf32>
    %276 = arith.addf %274, %275 : vector<2x32xf32>
    %277 = arith.negf %276 : vector<2x32xf32>
    %278 = math.exp %277 : vector<2x32xf32>
    %cst_67 = arith.constant 1.000000e+00 : f32
    %279 = vector.broadcast %cst_67 : f32 to vector<2x32xf32>
    %280 = arith.addf %279, %278 : vector<2x32xf32>
    %281 = arith.divf %279, %280 : vector<2x32xf32>
    %282 = vector.extract_strided_slice %264 {offsets = [0, 64], sizes = [2, 32], strides = [1, 1]} : vector<2x96xf32> to vector<2x32xf32>
    %283 = vector.extract_strided_slice %265 {offsets = [0, 64], sizes = [2, 32], strides = [1, 1]} : vector<2x96xf32> to vector<2x32xf32>
    %284 = arith.addf %283, %202 : vector<2x32xf32>
    %285 = arith.mulf %273, %284 : vector<2x32xf32>
    %286 = arith.addf %282, %285 : vector<2x32xf32>
    %287 = math.tanh %286 : vector<2x32xf32>
    %cst_68 = arith.constant 1.000000e+00 : f32
    %288 = vector.broadcast %cst_68 : f32 to vector<2x32xf32>
    %289 = arith.subf %288, %281 : vector<2x32xf32>
    %290 = arith.mulf %289, %287 : vector<2x32xf32>
    %291 = arith.mulf %281, %262 : vector<2x32xf32>
    %292 = arith.addf %290, %291 : vector<2x32xf32>
    %c4 = arith.constant 4 : index
    %c0_69 = arith.constant 0 : index
    %293 = vector.load %arg15[%c4, %c0_69] : memref<8x32xf32, #tpu.memory_space<vmem>>, vector<2x32xf32>
    tpu.vector_store %arg15[%c4, %c0_69], %292 {strides = array<i32>} : memref<8x32xf32, #tpu.memory_space<vmem>>, vector<2x32xf32>,
    %294 = vector.extract_strided_slice %198 {offsets = [6, 0], sizes = [2, 96], strides = [1, 1]} : vector<8x96xf32> to vector<2x96xf32>
    %cst_70 = arith.constant dense<0.000000e+00> : vector<2x96xf32>
    %295 = tpu.matmul %292, %199, %cst_70 {dimension_numbers = #tpu.dot_dimension_numbers<[1], [0], [0], [1], [0, 0, 1, 1], [], []>} : vector<2x32xf32>, vector<32x96xf32>, vector<2x96xf32> -> vector<2x96xf32>
    %296 = vector.extract_strided_slice %294 {offsets = [0, 0], sizes = [2, 32], strides = [1, 1]} : vector<2x96xf32> to vector<2x32xf32>
    %297 = vector.extract_strided_slice %295 {offsets = [0, 0], sizes = [2, 32], strides = [1, 1]} : vector<2x96xf32> to vector<2x32xf32>
    %298 = arith.addf %296, %297 : vector<2x32xf32>
    %299 = arith.negf %298 : vector<2x32xf32>
    %300 = math.exp %299 : vector<2x32xf32>
    %cst_71 = arith.constant 1.000000e+00 : f32
    %301 = vector.broadcast %cst_71 : f32 to vector<2x32xf32>
    %302 = arith.addf %301, %300 : vector<2x32xf32>
    %303 = arith.divf %301, %302 : vector<2x32xf32>
    %304 = vector.extract_strided_slice %294 {offsets = [0, 32], sizes = [2, 32], strides = [1, 1]} : vector<2x96xf32> to vector<2x32xf32>
    %305 = vector.extract_strided_slice %295 {offsets = [0, 32], sizes = [2, 32], strides = [1, 1]} : vector<2x96xf32> to vector<2x32xf32>
    %306 = arith.addf %304, %305 : vector<2x32xf32>
    %307 = arith.negf %306 : vector<2x32xf32>
    %308 = math.exp %307 : vector<2x32xf32>
    %cst_72 = arith.constant 1.000000e+00 : f32
    %309 = vector.broadcast %cst_72 : f32 to vector<2x32xf32>
    %310 = arith.addf %309, %308 : vector<2x32xf32>
    %311 = arith.divf %309, %310 : vector<2x32xf32>
    %312 = vector.extract_strided_slice %294 {offsets = [0, 64], sizes = [2, 32], strides = [1, 1]} : vector<2x96xf32> to vector<2x32xf32>
    %313 = vector.extract_strided_slice %295 {offsets = [0, 64], sizes = [2, 32], strides = [1, 1]} : vector<2x96xf32> to vector<2x32xf32>
    %314 = arith.addf %313, %202 : vector<2x32xf32>
    %315 = arith.mulf %303, %314 : vector<2x32xf32>
    %316 = arith.addf %312, %315 : vector<2x32xf32>
    %317 = math.tanh %316 : vector<2x32xf32>
    %cst_73 = arith.constant 1.000000e+00 : f32
    %318 = vector.broadcast %cst_73 : f32 to vector<2x32xf32>
    %319 = arith.subf %318, %311 : vector<2x32xf32>
    %320 = arith.mulf %319, %317 : vector<2x32xf32>
    %321 = arith.mulf %311, %292 : vector<2x32xf32>
    %322 = arith.addf %320, %321 : vector<2x32xf32>
    %c6 = arith.constant 6 : index
    %c0_74 = arith.constant 0 : index
    %323 = vector.load %arg15[%c6, %c0_74] : memref<8x32xf32, #tpu.memory_space<vmem>>, vector<2x32xf32>
    tpu.vector_store %arg15[%c6, %c0_74], %322 {strides = array<i32>} : memref<8x32xf32, #tpu.memory_space<vmem>>, vector<2x32xf32>,
    %c0_75 = arith.constant 0 : index
    %c0_76 = arith.constant 0 : index
    %324 = vector.load %arg14[%c0_75, %c0_76] : memref<2x32xf32, #tpu.memory_space<vmem>>, vector<2x32xf32>
    tpu.vector_store %arg14[%c0_75, %c0_76], %322 {strides = array<i32>} : memref<2x32xf32, #tpu.memory_space<vmem>>, vector<2x32xf32>,
    %c0_77 = arith.constant 0 : index
    %c0_78 = arith.constant 0 : index
    %325 = vector.load %arg6[%c0_77, %c0_78] : memref<9x32xf32, #tpu.memory_space<vmem>>, vector<9x32xf32>
    %c0_79 = arith.constant 0 : index
    %c0_80 = arith.constant 0 : index
    %326 = vector.load %arg15[%c0_79, %c0_80] : memref<8x32xf32, #tpu.memory_space<vmem>>, vector<8x32xf32>
    %c0_81 = arith.constant 0 : index
    %c0_82 = arith.constant 0 : index
    %c0_83 = arith.constant 0 : index
    %327 = vector.load %arg5[%c0_81, %c0_82, %c0_83] : memref<3x32x32xf32, #tpu.memory_space<vmem>>, vector<1x32x32xf32>
    %328 = vector.shape_cast %327 : vector<1x32x32xf32> to vector<32x32xf32>
    %cst_84 = arith.constant dense<0.000000e+00> : vector<8x32xf32>
    %329 = tpu.matmul %326, %328, %cst_84 {dimension_numbers = #tpu.dot_dimension_numbers<[1], [0], [0], [1], [0, 0, 1, 1], [], []>} : vector<8x32xf32>, vector<32x32xf32>, vector<8x32xf32> -> vector<8x32xf32>
    %330 = vector.extract_strided_slice %325 {offsets = [0, 0], sizes = [1, 32], strides = [1, 1]} : vector<9x32xf32> to vector<1x32xf32>
    %331 = vector.broadcast %330 : vector<1x32xf32> to vector<8x32xf32>
    %332 = arith.addf %329, %331 : vector<8x32xf32>
    %333 = vector.extract_strided_slice %325 {offsets = [1, 0], sizes = [1, 32], strides = [1, 1]} : vector<9x32xf32> to vector<1x32xf32>
    %334 = vector.extract_strided_slice %325 {offsets = [2, 0], sizes = [1, 32], strides = [1, 1]} : vector<9x32xf32> to vector<1x32xf32>
    %cst_85 = arith.constant dense<0.000000e+00> : vector<8xf32>
    %335 = vector.multi_reduction <add>, %332, %cst_85 [1] : vector<8x32xf32> to vector<8xf32>
    %336 = vector.shape_cast %335 : vector<8xf32> to vector<8x1xf32>
    %cst_86 = arith.constant 3.200000e+01 : f32
    %337 = vector.broadcast %cst_86 : f32 to vector<8x1xf32>
    %338 = arith.divf %336, %337 : vector<8x1xf32>
    %339 = vector.broadcast %338 : vector<8x1xf32> to vector<8x32xf32>
    %340 = arith.subf %332, %339 : vector<8x32xf32>
    %341 = arith.mulf %340, %340 : vector<8x32xf32>
    %cst_87 = arith.constant dense<0.000000e+00> : vector<8xf32>
    %342 = vector.multi_reduction <add>, %341, %cst_87 [1] : vector<8x32xf32> to vector<8xf32>
    %343 = vector.shape_cast %342 : vector<8xf32> to vector<8x1xf32>
    %cst_88 = arith.constant 3.200000e+01 : f32
    %344 = vector.broadcast %cst_88 : f32 to vector<8x1xf32>
    %345 = arith.divf %343, %344 : vector<8x1xf32>
    %346 = vector.broadcast %338 : vector<8x1xf32> to vector<8x32xf32>
    %347 = arith.subf %332, %346 : vector<8x32xf32>
    %cst_89 = arith.constant 9.99999974E-6 : f32
    %348 = vector.broadcast %cst_89 : f32 to vector<8x1xf32>
    %349 = arith.addf %345, %348 : vector<8x1xf32>
    %350 = math.rsqrt %349 : vector<8x1xf32>
    %351 = vector.broadcast %350 : vector<8x1xf32> to vector<8x32xf32>
    %352 = arith.mulf %347, %351 : vector<8x32xf32>
    %353 = vector.broadcast %333 : vector<1x32xf32> to vector<8x32xf32>
    %354 = arith.mulf %352, %353 : vector<8x32xf32>
    %355 = vector.broadcast %334 : vector<1x32xf32> to vector<8x32xf32>
    %356 = arith.addf %354, %355 : vector<8x32xf32>
    %cst_90 = arith.constant 0.000000e+00 : f32
    %357 = vector.broadcast %cst_90 : f32 to vector<8x32xf32>
    %358 = arith.maximumf %356, %357 : vector<8x32xf32>
    %c1_91 = arith.constant 1 : index
    %c0_92 = arith.constant 0 : index
    %c0_93 = arith.constant 0 : index
    %359 = vector.load %arg5[%c1_91, %c0_92, %c0_93] : memref<3x32x32xf32, #tpu.memory_space<vmem>>, vector<1x32x32xf32>
    %360 = vector.shape_cast %359 : vector<1x32x32xf32> to vector<32x32xf32>
    %cst_94 = arith.constant dense<0.000000e+00> : vector<8x32xf32>
    %361 = tpu.matmul %358, %360, %cst_94 {dimension_numbers = #tpu.dot_dimension_numbers<[1], [0], [0], [1], [0, 0, 1, 1], [], []>} : vector<8x32xf32>, vector<32x32xf32>, vector<8x32xf32> -> vector<8x32xf32>
    %362 = vector.extract_strided_slice %325 {offsets = [3, 0], sizes = [1, 32], strides = [1, 1]} : vector<9x32xf32> to vector<1x32xf32>
    %363 = vector.broadcast %362 : vector<1x32xf32> to vector<8x32xf32>
    %364 = arith.addf %361, %363 : vector<8x32xf32>
    %365 = vector.extract_strided_slice %325 {offsets = [4, 0], sizes = [1, 32], strides = [1, 1]} : vector<9x32xf32> to vector<1x32xf32>
    %366 = vector.extract_strided_slice %325 {offsets = [5, 0], sizes = [1, 32], strides = [1, 1]} : vector<9x32xf32> to vector<1x32xf32>
    %cst_95 = arith.constant dense<0.000000e+00> : vector<8xf32>
    %367 = vector.multi_reduction <add>, %364, %cst_95 [1] : vector<8x32xf32> to vector<8xf32>
    %368 = vector.shape_cast %367 : vector<8xf32> to vector<8x1xf32>
    %cst_96 = arith.constant 3.200000e+01 : f32
    %369 = vector.broadcast %cst_96 : f32 to vector<8x1xf32>
    %370 = arith.divf %368, %369 : vector<8x1xf32>
    %371 = vector.broadcast %370 : vector<8x1xf32> to vector<8x32xf32>
    %372 = arith.subf %364, %371 : vector<8x32xf32>
    %373 = arith.mulf %372, %372 : vector<8x32xf32>
    %cst_97 = arith.constant dense<0.000000e+00> : vector<8xf32>
    %374 = vector.multi_reduction <add>, %373, %cst_97 [1] : vector<8x32xf32> to vector<8xf32>
    %375 = vector.shape_cast %374 : vector<8xf32> to vector<8x1xf32>
    %cst_98 = arith.constant 3.200000e+01 : f32
    %376 = vector.broadcast %cst_98 : f32 to vector<8x1xf32>
    %377 = arith.divf %375, %376 : vector<8x1xf32>
    %378 = vector.broadcast %370 : vector<8x1xf32> to vector<8x32xf32>
    %379 = arith.subf %364, %378 : vector<8x32xf32>
    %cst_99 = arith.constant 9.99999974E-6 : f32
    %380 = vector.broadcast %cst_99 : f32 to vector<8x1xf32>
    %381 = arith.addf %377, %380 : vector<8x1xf32>
    %382 = math.rsqrt %381 : vector<8x1xf32>
    %383 = vector.broadcast %382 : vector<8x1xf32> to vector<8x32xf32>
    %384 = arith.mulf %379, %383 : vector<8x32xf32>
    %385 = vector.broadcast %365 : vector<1x32xf32> to vector<8x32xf32>
    %386 = arith.mulf %384, %385 : vector<8x32xf32>
    %387 = vector.broadcast %366 : vector<1x32xf32> to vector<8x32xf32>
    %388 = arith.addf %386, %387 : vector<8x32xf32>
    %cst_100 = arith.constant 0.000000e+00 : f32
    %389 = vector.broadcast %cst_100 : f32 to vector<8x32xf32>
    %390 = arith.maximumf %388, %389 : vector<8x32xf32>
    %c2_101 = arith.constant 2 : index
    %c0_102 = arith.constant 0 : index
    %c0_103 = arith.constant 0 : index
    %391 = vector.load %arg5[%c2_101, %c0_102, %c0_103] : memref<3x32x32xf32, #tpu.memory_space<vmem>>, vector<1x32x32xf32>
    %392 = vector.shape_cast %391 : vector<1x32x32xf32> to vector<32x32xf32>
    %cst_104 = arith.constant dense<0.000000e+00> : vector<8x32xf32>
    %393 = tpu.matmul %390, %392, %cst_104 {dimension_numbers = #tpu.dot_dimension_numbers<[1], [0], [0], [1], [0, 0, 1, 1], [], []>} : vector<8x32xf32>, vector<32x32xf32>, vector<8x32xf32> -> vector<8x32xf32>
    %394 = vector.extract_strided_slice %325 {offsets = [6, 0], sizes = [1, 32], strides = [1, 1]} : vector<9x32xf32> to vector<1x32xf32>
    %395 = vector.broadcast %394 : vector<1x32xf32> to vector<8x32xf32>
    %396 = arith.addf %393, %395 : vector<8x32xf32>
    %397 = vector.extract_strided_slice %325 {offsets = [7, 0], sizes = [1, 32], strides = [1, 1]} : vector<9x32xf32> to vector<1x32xf32>
    %398 = vector.extract_strided_slice %325 {offsets = [8, 0], sizes = [1, 32], strides = [1, 1]} : vector<9x32xf32> to vector<1x32xf32>
    %cst_105 = arith.constant dense<0.000000e+00> : vector<8xf32>
    %399 = vector.multi_reduction <add>, %396, %cst_105 [1] : vector<8x32xf32> to vector<8xf32>
    %400 = vector.shape_cast %399 : vector<8xf32> to vector<8x1xf32>
    %cst_106 = arith.constant 3.200000e+01 : f32
    %401 = vector.broadcast %cst_106 : f32 to vector<8x1xf32>
    %402 = arith.divf %400, %401 : vector<8x1xf32>
    %403 = vector.broadcast %402 : vector<8x1xf32> to vector<8x32xf32>
    %404 = arith.subf %396, %403 : vector<8x32xf32>
    %405 = arith.mulf %404, %404 : vector<8x32xf32>
    %cst_107 = arith.constant dense<0.000000e+00> : vector<8xf32>
    %406 = vector.multi_reduction <add>, %405, %cst_107 [1] : vector<8x32xf32> to vector<8xf32>
    %407 = vector.shape_cast %406 : vector<8xf32> to vector<8x1xf32>
    %cst_108 = arith.constant 3.200000e+01 : f32
    %408 = vector.broadcast %cst_108 : f32 to vector<8x1xf32>
    %409 = arith.divf %407, %408 : vector<8x1xf32>
    %410 = vector.broadcast %402 : vector<8x1xf32> to vector<8x32xf32>
    %411 = arith.subf %396, %410 : vector<8x32xf32>
    %cst_109 = arith.constant 9.99999974E-6 : f32
    %412 = vector.broadcast %cst_109 : f32 to vector<8x1xf32>
    %413 = arith.addf %409, %412 : vector<8x1xf32>
    %414 = math.rsqrt %413 : vector<8x1xf32>
    %415 = vector.broadcast %414 : vector<8x1xf32> to vector<8x32xf32>
    %416 = arith.mulf %411, %415 : vector<8x32xf32>
    %417 = vector.broadcast %397 : vector<1x32xf32> to vector<8x32xf32>
    %418 = arith.mulf %416, %417 : vector<8x32xf32>
    %419 = vector.broadcast %398 : vector<1x32xf32> to vector<8x32xf32>
    %420 = arith.addf %418, %419 : vector<8x32xf32>
    %cst_110 = arith.constant 0.000000e+00 : f32
    %421 = vector.broadcast %cst_110 : f32 to vector<8x32xf32>
    %422 = arith.maximumf %420, %421 : vector<8x32xf32>
    %c0_111 = arith.constant 0 : index
    %c0_112 = arith.constant 0 : index
    %423 = vector.load %arg11[%c0_111, %c0_112] : memref<32x128xf32, #tpu.memory_space<vmem>>, vector<32x128xf32>
    %cst_113 = arith.constant dense<0.000000e+00> : vector<8x128xf32>
    %424 = tpu.matmul %422, %423, %cst_113 {dimension_numbers = #tpu.dot_dimension_numbers<[1], [0], [0], [1], [0, 0, 1, 1], [], []>} : vector<8x32xf32>, vector<32x128xf32>, vector<8x128xf32> -> vector<8x128xf32>
    %c0_114 = arith.constant 0 : index
    %c0_115 = arith.constant 0 : index
    %425 = vector.load %arg12[%c0_114, %c0_115] : memref<1x128xf32, #tpu.memory_space<vmem>>, vector<1x128xf32>
    %426 = vector.broadcast %425 : vector<1x128xf32> to vector<8x128xf32>
    %427 = arith.addf %424, %426 : vector<8x128xf32>
    %428 = arith.negf %427 : vector<8x128xf32>
    %429 = math.exp %428 : vector<8x128xf32>
    %cst_116 = arith.constant 1.000000e+00 : f32
    %430 = vector.broadcast %cst_116 : f32 to vector<8x128xf32>
    %431 = arith.addf %430, %429 : vector<8x128xf32>
    %432 = arith.divf %430, %431 : vector<8x128xf32>
    %cst_117 = arith.constant 2.30258512 : f32
    %433 = vector.broadcast %cst_117 : f32 to vector<8x128xf32>
    %434 = math.powf %432, %433 : vector<8x128xf32>
    %cst_118 = arith.constant 2.000000e+00 : f32
    %435 = vector.broadcast %cst_118 : f32 to vector<8x128xf32>
    %436 = arith.mulf %435, %434 : vector<8x128xf32>
    %cst_119 = arith.constant 1.000000e-07 : f32
    %437 = vector.broadcast %cst_119 : f32 to vector<8x128xf32>
    %438 = arith.addf %436, %437 : vector<8x128xf32>
    %439 = tpu.iota {dimensions = array<i32: 1>} : vector<8x128xi32>
    %c1_i32 = arith.constant 1 : i32
    %440 = vector.broadcast %c1_i32 : i32 to vector<8x128xi32>
    %441 = arith.cmpi sge, %439, %440 : vector<8x128xi32>
    %c9_i32 = arith.constant 9 : i32
    %442 = vector.broadcast %c9_i32 : i32 to vector<8x128xi32>
    %443 = arith.cmpi slt, %439, %442 : vector<8x128xi32>
    %444 = arith.andi %441, %443 : vector<8x128xi1>
    %cst_120 = arith.constant 0.000000e+00 : f32
    %445 = vector.broadcast %cst_120 : f32 to vector<8x128xf32>
    %446 = arith.select %444, %438, %445 : vector<8x128xi1>, vector<8x128xf32>
    %cst_121 = arith.constant dense<0.000000e+00> : vector<8xf32>
    %447 = vector.multi_reduction <add>, %446, %cst_121 [1] : vector<8x128xf32> to vector<8xf32>
    %448 = vector.shape_cast %447 : vector<8xf32> to vector<8x1xf32>
    %449 = tpu.reciprocal %448 {approx = true} : vector<8x1xf32> -> vector<8x1xf32>
    %450 = arith.mulf %448, %449 : vector<8x1xf32>
    %cst_122 = arith.constant 2.000000e+00 : f32
    %451 = vector.broadcast %cst_122 : f32 to vector<8x1xf32>
    %452 = arith.subf %451, %450 : vector<8x1xf32>
    %453 = arith.mulf %449, %452 : vector<8x1xf32>
    %454 = vector.broadcast %453 : vector<8x1xf32> to vector<8x128xf32>
    %455 = arith.mulf %438, %454 : vector<8x128xf32>
    %456 = arith.select %444, %455, %438 : vector<8x128xi1>, vector<8x128xf32>
    %c0_123 = arith.constant 0 : index
    %c0_124 = arith.constant 0 : index
    %457 = vector.load %arg13[%c0_123, %c0_124] : memref<8x128xf32, #tpu.memory_space<vmem>>, vector<8x128xf32>
    tpu.vector_store %arg13[%c0_123, %c0_124], %456 {strides = array<i32>} : memref<8x128xf32, #tpu.memory_space<vmem>>, vector<8x128xf32>,
    return
  }
  func.func @transform_0(%arg0: i32) -> (i32, i32) {
    %c0_i32 = arith.constant 0 : i32
    %c0_i32_0 = arith.constant 0 : i32
    return %arg0, %c0_i32 : i32, i32
  }
  func.func @transform_1(%arg0: i32) -> (i32, i32) {
    %c0_i32 = arith.constant 0 : i32
    %c0_i32_0 = arith.constant 0 : i32
    %c0_i32_1 = arith.constant 0 : i32
    return %c0_i32, %c0_i32_0 : i32, i32
  }
  func.func @transform_2(%arg0: i32) -> (i32, i32, i32) {
    %c0_i32 = arith.constant 0 : i32
    %c0_i32_0 = arith.constant 0 : i32
    %c0_i32_1 = arith.constant 0 : i32
    %c0_i32_2 = arith.constant 0 : i32
    return %c0_i32, %c0_i32_0, %c0_i32_1 : i32, i32, i32
  }
  func.func @transform_3(%arg0: i32) -> (i32, i32) {
    %c0_i32 = arith.constant 0 : i32
    %c0_i32_0 = arith.constant 0 : i32
    %c0_i32_1 = arith.constant 0 : i32
    return %c0_i32, %c0_i32_0 : i32, i32
  }
  func.func @transform_4(%arg0: i32) -> (i32, i32, i32) {
    %c0_i32 = arith.constant 0 : i32
    %c0_i32_0 = arith.constant 0 : i32
    %c0_i32_1 = arith.constant 0 : i32
    %c0_i32_2 = arith.constant 0 : i32
    return %c0_i32, %c0_i32_0, %c0_i32_1 : i32, i32, i32
  }
  func.func @transform_5(%arg0: i32) -> (i32, i32) {
    %c0_i32 = arith.constant 0 : i32
    %c0_i32_0 = arith.constant 0 : i32
    %c0_i32_1 = arith.constant 0 : i32
    return %c0_i32, %c0_i32_0 : i32, i32
  }
  func.func @transform_6(%arg0: i32) -> (i32, i32) {
    %c0_i32 = arith.constant 0 : i32
    %c0_i32_0 = arith.constant 0 : i32
    %c0_i32_1 = arith.constant 0 : i32
    return %c0_i32, %c0_i32_0 : i32, i32
  }
  func.func @transform_7(%arg0: i32) -> (i32, i32) {
    %c0_i32 = arith.constant 0 : i32
    %c0_i32_0 = arith.constant 0 : i32
    %c0_i32_1 = arith.constant 0 : i32
    return %c0_i32, %c0_i32_0 : i32, i32
  }
  func.func @transform_8(%arg0: i32) -> (i32, i32) {
    %c0_i32 = arith.constant 0 : i32
    %c0_i32_0 = arith.constant 0 : i32
    %c0_i32_1 = arith.constant 0 : i32
    return %c0_i32, %c0_i32_0 : i32, i32
  }
  func.func @transform_9(%arg0: i32) -> (i32, i32) {
    %c0_i32 = arith.constant 0 : i32
    %c0_i32_0 = arith.constant 0 : i32
    %c0_i32_1 = arith.constant 0 : i32
    return %c0_i32, %c0_i32_0 : i32, i32
  }
  func.func @transform_10(%arg0: i32) -> (i32, i32) {
    %c0_i32 = arith.constant 0 : i32
    %c0_i32_0 = arith.constant 0 : i32
    %c0_i32_1 = arith.constant 0 : i32
    return %c0_i32, %c0_i32_0 : i32, i32
  }
  func.func @transform_11(%arg0: i32) -> (i32, i32) {
    %c0_i32 = arith.constant 0 : i32
    %c0_i32_0 = arith.constant 0 : i32
    %c0_i32_1 = arith.constant 0 : i32
    return %c0_i32, %c0_i32_0 : i32, i32
  }
  func.func @transform_12(%arg0: i32) -> (i32, i32) {
    %c0_i32 = arith.constant 0 : i32
    %c0_i32_0 = arith.constant 0 : i32
    return %arg0, %c0_i32 : i32, i32
  }
}

</mosaic_0001>

<bundles_post_ra>
// kernel: decoder_forward.1
= control target key start
LH: loop header
LB: loop body
LE: loop exit
PB: predicated region body
PF: predicated region fallthrough
CT: control target
= control target key end

     0   :  { %s2363_s21 = smov 0   ;;  %s2774_s0 = inlined_call_operand.vmem [shape: f32[16,18], index: 0, kind: input, shape index: {}]   ;;  %s2775_s1 = inlined_call_operand.vmem [shape: f32[1,64], index: 1, kind: input, shape index: {}]   ;;  %s2776_s2 = inlined_call_operand.vmem [shape: f32[2,64,64], index: 2, kind: input, shape index: {}]   ;;  %s2777_s3 = inlined_call_operand.vmem [shape: f32[9,64], index: 3, kind: input, shape index: {}]   ;;  %s2778_s4 = inlined_call_operand.vmem [shape: f32[3,32,32], index: 4, kind: input, shape index: {}]   ;;  %s2779_s5 = inlined_call_operand.vmem [shape: f32[9,32], index: 5, kind: input, shape index: {}]   ;;  %s2780_s6 = inlined_call_operand.vmem [shape: f32[64,96], index: 6, kind: input, shape index: {}]   ;;  %s2781_s7 = inlined_call_operand.vmem [shape: f32[16,96], index: 7, kind: input, shape index: {}]   ;;  %s2782_s8 = inlined_call_operand.vmem [shape: f32[32,96], index: 8, kind: input, shape index: {}]   ;;  %s2783_s9 = inlined_call_operand.vmem [shape: f32[2,96], index: 9, kind: input, shape index: {}]   ;;  %s2784_s10 = inlined_call_operand.vmem [shape: f32[32,128], index: 10, kind: input, shape index: {}]   ;;  %s2785_s11 = inlined_call_operand.vmem [shape: f32[1,128], index: 11, kind: input, shape index: {}]   ;;  %s2786_s12 = inlined_call_operand.vmem [shape: f32[16,128], index: 12, kind: output, shape index: {}]  }
   0x1 LB: > { %s1832_s22 = sadd.s32 4294967295, %s2286_s21   ;;  %p1836_p0 = scmp.ge.s32.totalorder %s2286_s21, 1  ;;  %s2286_s21 = sphi %s2363_s21, %s22_s21  }
   0x2   : > { %p361_p1 = scmp.lt.s32.totalorder %s2286_s21, 3 }
   0x4   : > { %p362_p2 = pnand %p1836_p0, %p361_p1 }
   0x5   : > { %p401_p3 = scmp.lt.s32.totalorder (!%p362_p2), %s1832_s22, 1  ;;  %p1839_p4 = scmp.ne.s32.totalorder (!%p362_p2), %s1832_s22, 0 }
   0x6   : > { %365 = sbr.rel (%p362_p2) target bundleno = 6299 (0x189b), region = 68 }
   0xd   : > { %s402_s23 = scalar_select %p401_p3, %s1832_s22, 1 }
   0xe   : > { %412 = sbr.rel (%p1839_p4) target bundleno = 21 (0x15), region = 72  ;;  %vm413_vm0 = vcmask (!%p1839_p4), 254976   ;;  %v2288_v0 = vmov (!%p1839_p4), 0.0  }
   0xf   : > { %s1837_s24 = sshll.u32 %s402_s23, 3  ;;  %414 = vst.msk [vmem:[#allocation2] sm:$0x3] (!%p1839_p4), %vm413_vm0, %v2288_v0 }
  0x10   : > { %s404_s27 = scalar_lea.vmem %s2774_s0, %s1837_s24  ;;  %s2377_s30 = scalar_lea.vmem %s2786_s12, %s1837_s24 }
  0x15 PF: > { %v2379_v1 = vld [vmem:[%s404_s27] sm:$0xff]  ;;  %v2289_v2 = vmov 0   ;;  %v2290_v3 = vmov 1   ;;  %v418_v4 = vlaneseq  ;;  %vm448_vm2 = vcmask 523264   ;;  %v485_v32 = vld [vmem:[%s2776_s2 + $0x8] sm:$0xff]  ;;  %v486_v33 = vld [vmem:[%s2776_s2 + $0x10] sm:$0xff] }
  0x16   : > { %2232 = vset.pattern.permute.xlu0 %v2289_v2  ;;  %v2393_v9 = vld [vmem:[%s2777_s3] sm:$0xff]  ;;  %v2291_v34 = vmov 0.0|0.0   ;;  %v487_v36 = vld [vmem:[%s2776_s2 + $0x18] sm:$0xff]  ;;  %vm2292_vm3 = vmmov 0   ;;  %v2293_v37 = vmov 0.0   ;;  %v489_v40 = vld [vmem:[%s2776_s2 + $0x28] sm:$0xff] }
  0x17   : > { %425 = vperm.xlu0 %2232, %v2379_v1   ;;  %v2383_v5 = vshrl.u32 %v418_v4, 7  ;;  %v2385_v6 = vand.u32 127, %v418_v4  ;;  %v1840_v10 = vld [vmem:[%s2775_s1] ss:$0 sm:$0xff]  ;;  %2101 = vmatprep.subr.bf16.mxu0 %v2291_v34  ;;  %v2105_v38 = vpack.c.bf16 %v487_v36, %v486_v33  ;;  %v490_v42 = vld [vmem:[%s2776_s2 + $0x30] sm:$0xff]  ;;  %v491_v43 = vld [vmem:[%s2776_s2 + $0x38] sm:$0xff] }
  0x18   : > { %v484_v31 = vld [vmem:[%s2776_s2] sm:$0xff]  ;;  %1965 = vmatprep.mubr.msk.f32.mxu0 %vm2292_vm3, %v2293_v37  ;;  %2113 = vmatprep.subr.bf16.mxu1 %v2291_v34  ;;  %v2111_v44 = vpack.c.bf16 %v491_v43, %v490_v42  ;;  %s2294_s17 = smov 126   ;;  %vm742_vm4 = vcmask 130048   ;;  %vm902_vm5 = vcmask 261120   ;;  %s2295_s16 = smov 64   ;;  %vm1010_vm6 = vcmask 254976  }
  0x19   : > { %v2388_v8 = vsub.s32 0, %v2383_v5  ;;  %vm420_vm1 = vcmp.lt.s32.totalorder %v2385_v6, 32  ;;  %v2102_v35 = vpack.c.bf16 %v485_v32, %v484_v31  ;;  %1984 = vmatprep.mubr.msk.f32.mxu1 %vm2292_vm3, %v2293_v37  ;;  %v488_v39 = vld [vmem:[%s2776_s2 + $0x20] sm:$0xff]  ;;  %v2450_v50 = vsub.s32 1, %v2383_v5  ;;  %s2296_s19 = smov 32   ;;  %s2297_s20 = smov 96  }
  0x1a   : > { %v2108_v41 = vpack.c.bf16 %v489_v40, %v488_v39  ;;  %v480_v51 = vsub.s32 2, %v2383_v5  ;;  %v494_v59 = vsub.s32 3, %v2383_v5  ;;  %v597_v39 = vsub.s32 4, %v2383_v5 }
  0x1b   : > { %2233 = vset.pattern.permute.xlu0 %v2290_v3  ;;  %v444_v11 = vrot.slane %v2393_v9, %v2388_v8  ;;  %2103 = vmatpush3.bf16.msra.mxu0 %v2102_v35  ;;  %v476_v52 = vrot.slane %v2393_v9, %v2450_v50  ;;  %v602_v40 = vsub.s32 5, %v2383_v5  ;;  %vm1121_vm7 = vcmask 257026  }
  0x1c   : > { %429 = vperm.xlu0 %2233, %v2379_v1   ;;  %2104 = vmatprep.subr.bf16.mxu0 %v2291_v34  ;;  %v481_v55 = vrot.slane %v2393_v9, %v480_v51  ;;  %v495_v60 = vrot.slane %v2393_v9, %v494_v59  ;;  %vm1235_vm8 = vcmask 259076   ;;  %vm1349_vm9 = vcmask 261126  }
  0x1d   : > { %vm1766_vm15 = vcmp.ge.s32.totalorder %v2385_v6, 1  ;;  %vm1767_vm0 = vcmp.lt.s32.totalorder %v2385_v6, 9 }
  0x1f   : > { %2106 = vmatpush3.bf16.msra.mxu0 %v2105_v38 }
  0x20   : > { %2107 = vmatprep.subr.bf16.mxu0 %v2291_v34 }
  0x23   : > { %2109 = vmatpush3.bf16.msra.mxu0 %v2108_v41  ;;  %v598_v41 = vrot.slane %v2393_v9, %v597_v39 }
  0x24   : > { %2110 = vmatprep.subr.bf16.mxu0 %v2291_v34 }
  0x27   : > { %2112 = vmatpush3.bf16.msra.mxu0 %v2111_v44  ;;  %v603_v44 = vrot.slane %v2393_v9, %v602_v40 }
  0x28   : > { %2125 = vmatprep.subr.bf16.mxu0 %v2291_v34 }
  0x96   : > { %v426_v7 = vpop.permute.xlu0 %425 }
  0x9b   : > { %v430_v12 = vpop.permute.xlu0 %429 }
  0x9c   : > { %v432_v13 = vsel %vm420_vm1, %v426_v7, %v430_v12 }
  0x9d   : > { %v440_v14 = vmul.f32 %v1840_v10, %v432_v13 }
  0x9f   : > { %v445_v15 = vadd.f32 %v444_v11, %v440_v14 }
  0xa1   : > { %v446_v16 = vsel %vm420_vm1, %v445_v15, 0.0 }
  0xa2   : > { %v449_v17 = vsel %vm448_vm2, %v446_v16, 0.0  ;;  %v447_v18 = vsub.f32 %v445_v15, %v446_v16 }
  0xa3   : > { %450 = vadd.xlane.f32.xlu1 %v449_v17 }
  0xa4   : > { %v452_v19 = vsel %vm448_vm2, %v447_v18, 0.0 }
  0xa7   : > { %453 = vadd.xlane.f32.xlu1 %v452_v19 }
 0x130   : > { %v451_v20 = vpop.xlane.xlu1 %450 }
 0x134   : > { %v454_v21 = vpop.xlane.xlu1 %453 }
 0x135   : > { %v455_v22 = vsel %vm420_vm1, %v451_v20, %v454_v21  ;;  %v1842_v20 = vld [vmem:[%s2776_s2 + $0x40] sm:$0xff]  ;;  %v1843_v21 = vld [vmem:[%s2776_s2 + $0x48] sm:$0xff] }
 0x136   : > { %v456_v23 = vmul.f32 0.03125, %v455_v22  ;;  %v1844_v22 = vld [vmem:[%s2776_s2 + $0x50] sm:$0xff] }
 0x138   : > { %v457_v24 = vsub.f32 %v445_v15, %v456_v23  ;;  %v2114_v23 = vpack.c.bf16 %v1843_v21, %v1842_v20 }
 0x13a   : > { %v458_v25 = vsel %vm420_vm1, %v457_v24, 0.0  ;;  %2115 = vmatpush3.bf16.msra.mxu1 %v2114_v23  ;;  %v731_v23 = vld [vmem:[%s2780_s6 + $0x8] sm:$0xff] }
 0x13b   : > { %v460_v26 = vmul.f32 %v458_v25, %v458_v25  ;;  %v459_v27 = vsub.f32 %v457_v24, %v458_v25  ;;  %2116 = vmatprep.subr.bf16.mxu1 %v2291_v34 }
 0x13d   : > { %v461_v28 = vsel %vm448_vm2, %v460_v26, 0.0  ;;  %v464_v29 = vmul.f32 %v459_v27, %v459_v27  ;;  %v1846_v26 = vld [vmem:[%s2776_s2 + $0x60] sm:$0xff]  ;;  %v1847_v27 = vld [vmem:[%s2776_s2 + $0x68] sm:$0xff] }
 0x13e   : > { %462 = vadd.xlane.f32.xlu1 %v461_v28  ;;  %v2120_v28 = vpack.c.bf16 %v1847_v27, %v1846_v26  ;;  %v733_v26 = vld [vmem:[%s2780_s6 + $0x18] sm:$0xff] }
 0x13f   : > { %v465_v30 = vsel %vm448_vm2, %v464_v29, 0.0  ;;  %v1848_v29 = vld [vmem:[%s2776_s2 + $0x70] sm:$0xff] }
 0x140   : > { %466 = vadd.xlane.f32.xlu0 %v465_v30  ;;  %v1849_v30 = vld [vmem:[%s2776_s2 + $0x78] sm:$0xff] }
 0x141   : > { %v2123_v31 = vpack.c.bf16 %v1849_v30, %v1848_v29  ;;  %v735_v29 = vld [vmem:[%s2780_s6 + $0x28] sm:$0xff] }
 0x156   : > { %740 = vrot.lane.b32.xlu0 %v2379_v1, %s2294_s17  ;;  %v738_v1 = vld [vmem:[%s2781_s7] sm:$0xff] }
 0x1cb   : > { %v463_v45 = vpop.xlane.xlu1 %462 }
 0x1cd   : > { %v467_v46 = vpop.xlane.xlu0 %466 }
 0x1ce   : > { %v468_v47 = vsel %vm420_vm1, %v463_v45, %v467_v46 }
 0x1cf   : > { %v469_v48 = vmul.f32 0.03125, %v468_v47 }
 0x1d1   : > { %v470_v49 = vadd.f32 1e-05, %v469_v48  ;;  %v617_v48 = vsub.s32 6, %v2383_v5 }
 0x1d3   : > { %2234 = vrsqrt.f32 %v470_v49  ;;  %v618_v49 = vrot.slane %v2393_v9, %v617_v48 }
 0x1dd   : > { %v2235_v53 = vpop.eup %2234 }
 0x1de   : > { %v472_v54 = vmul.f32 %v2235_v53, %v457_v24  ;;  %v1845_v24 = vld [vmem:[%s2776_s2 + $0x58] sm:$0xff] }
 0x1df   : > { %v2117_v25 = vpack.c.bf16 %v1845_v24, %v1844_v22  ;;  %v730_v22 = vld [vmem:[%s2780_s6] sm:$0xff] }
 0x1e0   : > { %v477_v56 = vmul.f32 %v476_v52, %v472_v54  ;;  %v2129_v24 = vpack.c.bf16 %v731_v23, %v730_v22 }
 0x1e1   : > { %2118 = vmatpush3.bf16.msra.mxu1 %v2117_v25  ;;  %v732_v25 = vld [vmem:[%s2780_s6 + $0x10] sm:$0xff] }
 0x1e2   : > { %v482_v57 = vadd.f32 %v481_v55, %v477_v56  ;;  %2119 = vmatprep.subr.bf16.mxu1 %v2291_v34  ;;  %v2132_v27 = vpack.c.bf16 %v733_v26, %v732_v25 }
 0x1e4   : > { %v483_v58 = vmax.f32 %v482_v57, 0.0 }
 0x1e5   : > { %2121 = vmatpush3.bf16.msra.mxu1 %v2120_v28  ;;  %v734_v28 = vld [vmem:[%s2780_s6 + $0x20] sm:$0xff] }
 0x1e6   : > { %1966 = vmatmul.mubr.msk.f32.vlgmr.msra.gmra.mrb[0].mxu0 %vm448_vm2, %v483_v58  ;;  %2122 = vmatprep.subr.bf16.mxu1 %v2291_v34  ;;  %v2135_v30 = vpack.c.bf16 %v735_v29, %v734_v28 }
 0x1e7   : > { %1991 = vmatprep.mubr.msk.f32.mxu0 %vm2292_vm3, %v2293_v37 }
 0x1e9   : > { %2124 = vmatpush3.bf16.msra.mxu1 %v2123_v31  ;;  %v736_v31 = vld [vmem:[%s2780_s6 + $0x30] sm:$0xff] }
 0x1ea   : > { %2128 = vmatprep.subr.bf16.mxu1 %v2291_v34 }
 0x2b9   : > { %v565_v61 = vpop.f32.mrb[0].mxu0 }
 0x2ba   : > { %v566_v62 = vadd.f32 %v565_v61, %v495_v60  ;;  %v1967_v63 = vpop.f32.mrb[1].mxu0  ;;  %v739_v60 = vld [vmem:[%s2781_s7 + $0x8] sm:$0xff]  ;;  %v893_v61 = vld [vmem:[%s2782_s8] sm:$0xff] }
 0x2bb   : > { %v894_v63 = vld [vmem:[%s2782_s8 + $0x8] sm:$0xff] }
 0x2bc   : > { %v569_v0 = vsel %vm420_vm1, %v566_v62, 0.0 }
 0x2bd   : > { %v571_v2 = vsel %vm448_vm2, %v569_v0, 0.0  ;;  %v570_v3 = vsub.f32 %v566_v62, %v569_v0  ;;  %v741_v0 = vpop.permute.xlu0 %740 }
 0x2be   : > { %572 = vadd.xlane.f32.xlu1 %v571_v2  ;;  %v2537_v2 = vpack.c.bf16 %v894_v63, %v893_v61 }
 0x2bf   : > { %v574_v4 = vsel %vm448_vm2, %v570_v3, 0.0  ;;  %v895_v3 = vld [vmem:[%s2782_s8 + $0x10] sm:$0xff] }
 0x2c2   : > { %575 = vadd.xlane.f32.xlu1 %v574_v4  ;;  %v896_v4 = vld [vmem:[%s2782_s8 + $0x18] sm:$0xff] }
 0x34b   : > { %v573_v7 = vpop.xlane.xlu1 %572 }
 0x34f   : > { %v576_v10 = vpop.xlane.xlu1 %575 }
 0x350   : > { %v577_v11 = vsel %vm420_vm1, %v573_v7, %v576_v10  ;;  %v2547_v7 = vpack.c.bf16 %v896_v4, %v895_v3  ;;  %v2553_v10 = vld [vmem:[#allocation2] sm:$0x3] }
 0x351   : > { %v578_v12 = vmul.f32 0.03125, %v577_v11 }
 0x353   : > { %v579_v13 = vsub.f32 %v566_v62, %v578_v12  ;;  %v2126_v62 = vpack.c.bf16 %v739_v60, %v738_v1 }
 0x355   : > { %v580_v14 = vsel %vm420_vm1, %v579_v13, 0.0  ;;  %2127 = vmatpush3.bf16.msra.mxu0 %v2126_v62 }
 0x356   : > { %v582_v15 = vmul.f32 %v580_v14, %v580_v14  ;;  %v581_v16 = vsub.f32 %v579_v13, %v580_v14  ;;  %2140 = vmatprep.subr.bf16.mxu0 %v2291_v34 }
 0x358   : > { %v583_v17 = vsel %vm448_vm2, %v582_v15, 0.0  ;;  %v586_v18 = vmul.f32 %v581_v16, %v581_v16  ;;  %1992 = vmatmul.mubr.msk.f32.vlgmr.msra.gmra.mrb[2].mxu0 %vm742_vm4, %v741_v0 }
 0x359   : > { %584 = vadd.xlane.f32.xlu1 %v583_v17  ;;  %2142 = vmatpush3.bf16.msra.mxu0 %v2537_v2 }
 0x35a   : > { %v587_v19 = vsel %vm448_vm2, %v586_v18, 0.0  ;;  %2021 = vmatprep.mubr.msk.f32.mxu0 %vm2292_vm3, %v2293_v37  ;;  %2143 = vmatprep.subr.bf16.mxu0 %v2291_v34 }
 0x35d   : > { %588 = vadd.xlane.f32.xlu1 %v587_v19  ;;  %2145 = vmatpush3.bf16.msra.mxu0 %v2547_v7 }
 0x35e   : > { %2146 = vmatprep.subr.bf16.mxu0 %v2291_v34 }
 0x360   : > { %2022 = vmatmul.mubr.msk.f32.vlgmr.msra.gmra.mrb[4].mxu0 %vm902_vm5, %v2553_v10 }
 0x361   : > { %2148 = vmatpush3.bf16.msra.mxu0 %v2537_v2  ;;  %2032 = vmatprep.mubr.msk.f32.mxu0 %vm2292_vm3, %v2293_v37 }
 0x362   : > { %2149 = vmatprep.subr.bf16.mxu0 %v2291_v34 }
 0x365   : > { %2151 = vmatpush3.bf16.msra.mxu0 %v2547_v7 }
 0x366   : > { %2158 = vmatprep.subr.bf16.mxu0 %v2291_v34 }
 0x3e6   : > { %v585_v32 = vpop.xlane.xlu1 %584 }
 0x3ea   : > { %v589_v33 = vpop.xlane.xlu1 %588 }
 0x3eb   : > { %v590_v35 = vsel %vm420_vm1, %v585_v32, %v589_v33  ;;  %v737_v32 = vld [vmem:[%s2780_s6 + $0x38] sm:$0xff] }
 0x3ec   : > { %v591_v36 = vmul.f32 0.03125, %v590_v35  ;;  %v2138_v33 = vpack.c.bf16 %v737_v32, %v736_v31 }
 0x3ee   : > { %v592_v38 = vadd.f32 1e-05, %v591_v36 }
 0x3f0   : > { %2236 = vrsqrt.f32 %v592_v38  ;;  %v729_v38 = vld [vmem:[%s2783_s9] sm:$0x3] }
 0x3fa   : > { %v2237_v42 = vpop.eup %2236 }
 0x3fb   : > { %v594_v43 = vmul.f32 %v2237_v42, %v579_v13 }
 0x3fd   : > { %v599_v45 = vmul.f32 %v598_v41, %v594_v43  ;;  %v2602_v41 = vrot.slane %v729_v38, %v2450_v50 }
 0x3ff   : > { %v604_v46 = vadd.f32 %v603_v44, %v599_v45 }
 0x401   : > { %v605_v47 = vmax.f32 %v604_v46, 0.0 }
 0x403   : > { %1985 = vmatmul.mubr.msk.f32.vlgmr.msra.gmra.mrb[0].mxu1 %vm448_vm2, %v605_v47 }
 0x404   : > { %2010 = vmatprep.mubr.msk.f32.mxu1 %vm2292_vm3, %v2293_v37  ;;  %2130 = vmatpush3.bf16.msra.mxu1 %v2129_v24 }
 0x405   : > { %2131 = vmatprep.subr.bf16.mxu1 %v2291_v34 }
 0x408   : > { %2133 = vmatpush3.bf16.msra.mxu1 %v2132_v27 }
 0x409   : > { %2134 = vmatprep.subr.bf16.mxu1 %v2291_v34 }
 0x40c   : > { %2136 = vmatpush3.bf16.msra.mxu1 %v2135_v30 }
 0x40d   : > { %2137 = vmatprep.subr.bf16.mxu1 %v2291_v34 }
 0x410   : > { %2139 = vmatpush3.bf16.msra.mxu1 %v2138_v33 }
 0x411   : > { %2152 = vmatprep.subr.bf16.mxu1 %v2291_v34 }
 0x42b   : > { %v811_v35 = vpop.f32.mrb[2].mxu0 }
 0x42c   : > { %v1993_v36 = vpop.f32.mrb[3].mxu0 }
 0x433   : > { %v972_v42 = vpop.f32.mrb[4].mxu0 }
 0x434   : > { %v983_v43 = vadd.f32 %v972_v42, %v2602_v41  ;;  %v2023_v44 = vpop.f32.mrb[5].mxu0 }
 0x4d6   : > { %v688_v52 = vpop.f32.mrb[0].mxu1 }
 0x4d7   : > { %v689_v53 = vadd.f32 %v688_v52, %v618_v49  ;;  %v1986_v54 = vpop.f32.mrb[1].mxu1 }
 0x4d9   : > { %v692_v55 = vsel %vm420_vm1, %v689_v53, 0.0 }
 0x4da   : > { %v694_v56 = vsel %vm448_vm2, %v692_v55, 0.0  ;;  %v693_v57 = vsub.f32 %v689_v53, %v692_v55 }
 0x4db   : > { %695 = vadd.xlane.f32.xlu1 %v694_v56 }
 0x4dc   : > { %v697_v58 = vsel %vm448_vm2, %v693_v57, 0.0  ;;  %v1851_v57 = vld [vmem:[%s2777_s3 + $0x8] ss:$0 sm:$0xff] }
 0x4df   : > { %698 = vadd.xlane.f32.xlu1 %v697_v58 }
 0x568   : > { %v696_v11 = vpop.xlane.xlu1 %695 }
 0x56c   : > { %v699_v12 = vpop.xlane.xlu1 %698 }
 0x56d   : > { %v700_v13 = vsel %vm420_vm1, %v696_v11, %v699_v12 }
 0x56e   : > { %v701_v14 = vmul.f32 0.03125, %v700_v13 }
 0x570   : > { %v702_v15 = vsub.f32 %v689_v53, %v701_v14  ;;  %v720_v53 = vsub.s32 7, %v2383_v5 }
 0x572   : > { %v703_v16 = vsel %vm420_vm1, %v702_v15, 0.0  ;;  %v721_v54 = vrot.slane %v2393_v9, %v720_v53  ;;  %v891_v9 = vrot.slane %v729_v38, %v2388_v8 }
 0x573   : > { %v705_v17 = vmul.f32 %v703_v16, %v703_v16  ;;  %v704_v18 = vsub.f32 %v702_v15, %v703_v16 }
 0x575   : > { %v706_v19 = vsel %vm448_vm2, %v705_v17, 0.0  ;;  %v709_v20 = vmul.f32 %v704_v18, %v704_v18 }
 0x576   : > { %707 = vadd.xlane.f32.xlu1 %v706_v19 }
 0x577   : > { %v710_v21 = vsel %vm448_vm2, %v709_v20, 0.0 }
 0x57a   : > { %711 = vadd.xlane.f32.xlu1 %v710_v21 }
 0x58b   : > { %985 = vrot.lane.b32.xlu1 %v983_v43, %s2295_s16 }
 0x603   : > { %v708_v45 = vpop.xlane.xlu1 %707 }
 0x607   : > { %v712_v46 = vpop.xlane.xlu1 %711 }
 0x608   : > { %v713_v47 = vsel %vm420_vm1, %v708_v45, %v712_v46  ;;  %vm1768_vm1 = vmand %vm1766_vm15, %vm1767_vm0 }
 0x609   : > { %v714_v49 = vmul.f32 0.03125, %v713_v47 }
 0x60b   : > { %v715_v52 = vadd.f32 1e-05, %v714_v49  ;;  %v986_v13 = vpop.permute.xlu1 %985 }
 0x60d   : > { %2238 = vrsqrt.f32 %v715_v52 }
 0x617   : > { %v2239_v55 = vpop.eup %2238 }
 0x618   : > { %v717_v56 = vmul.f32 %v2239_v55, %v702_v15 }
 0x61a   : > { %v722_v58 = vmul.f32 %v721_v54, %v717_v56 }
 0x61c   : > { %v727_v1 = vadd.f32 %v1851_v57, %v722_v58 }
 0x61e   : > { %v728_v60 = vmax.f32 %v727_v1, 0.0 }
 0x620   : > { %2011 = vmatmul.mubr.msk.f32.vlgmr.msra.gmra.mrb[2].mxu1 %vm448_vm2, %v728_v60 }
 0x621   : > { %2154 = vmatpush3.bf16.msra.mxu1 %v2537_v2  ;;  %2043 = vmatprep.mubr.msk.f32.mxu1 %vm2292_vm3, %v2293_v37 }
 0x622   : > { %2155 = vmatprep.subr.bf16.mxu1 %v2291_v34 }
 0x625   : > { %2157 = vmatpush3.bf16.msra.mxu1 %v2547_v7 }
 0x626   : > { %2164 = vmatprep.subr.bf16.mxu1 %v2291_v34 }
 0x6f3   : > { %v884_v61 = vpop.f32.mrb[2].mxu1 }
 0x6f4   : > { %v885_v62 = vadd.f32 %v884_v61, %v811_v35  ;;  %v2012_v63 = vpop.f32.mrb[3].mxu1 }
 0x6f6   : > { %v2623_v0 = vadd.f32 %v891_v9, %v885_v62 }
 0x6f8   : > { %v976_v3 = vadd.f32 %v972_v42, %v2623_v0 }
 0x6fa   : > { %v1855_v4 = vmul.f32 -1.442695, %v976_v3 }
 0x6fc   : > { %2240 = vpow2.f32 %v1855_v4 }
 0x706   : > { %v2241_v11 = vpop.eup %2240 }
 0x707   : > { %v980_v12 = vadd.f32 1.0, %v2241_v11 }
 0x709   : > { %2242 = vrcp.f32 %v980_v12 }
 0x713   : > { %v2243_v14 = vpop.eup %2242 }
 0x714   : > { %v988_v15 = vmul.f32 %v2243_v14, %v986_v13  ;;  %v995_v20 = vsub.f32 1.0, %v2243_v14 }
 0x716   : > { %990 = vrot.lane.b32.xlu1 %v988_v15, %s2295_s16 }
 0x71a   : > { %1001 = vrot.lane.b32.xlu1 %v2553_v10, %s2296_s19 }
 0x788   : > { %v991_v16 = vpop.permute.xlu1 %990 }
 0x789   : > { %v993_v17 = vadd.f32 %v991_v16, %v2623_v0 }
 0x78b   : > { %2244 = vtanh.f32 %v993_v17 }
 0x78c   : > { %v1002_v19 = vpop.permute.xlu1 %1001 }
 0x78d   : > { %v1004_v22 = vmul.f32 %v2243_v14, %v1002_v19 }
 0x795   : > { %v2245_v18 = vpop.eup %2244 }
 0x796   : > { %997 = vrot.lane.b32.xlu0 %v2245_v18, %s2297_s20 }
 0x808   : > { %v998_v21 = vpop.permute.xlu0 %997 }
 0x809   : > { %v1000_v23 = vmul.f32 %v998_v21, %v995_v20 }
 0x80b   : > { %v1005_v24 = vadd.f32 %v1004_v22, %v1000_v23 }
 0x80d   : > { %1007 = vrot.lane.b32.xlu0 %v1005_v24, %s2297_s20  ;;  %v1113_v43 = vrot.slane %v1005_v24, 6 }
 0x87f   : > { %v1008_v25 = vpop.permute.xlu0 %1007 }
 0x880   : > { %1011 = vst.msk [vmem:[#allocation3] sm:$0x3] %vm1010_vm6, %v1008_v25  ;;  %2033 = vmatmul.mubr.msk.f32.vlgmr.msra.gmra.mrb[6].mxu0 %vm902_vm5, %v1008_v25 }
 0x881   : > { %2160 = vmatpush3.bf16.msra.mxu0 %v2537_v2  ;;  %2054 = vmatprep.mubr.msk.f32.mxu0 %vm2292_vm3, %v2293_v37 }
 0x882   : > { %2161 = vmatprep.subr.bf16.mxu0 %v2291_v34 }
 0x885   : > { %2163 = vmatpush3.bf16.msra.mxu0 %v2547_v7 }
 0x886   : > { %2170 = vmatprep.subr.bf16.mxu0 %v2291_v34 }
 0x953   : > { %v1080_v10 = vpop.f32.mrb[6].mxu0 }
 0x954   : > { %v1094_v26 = vadd.f32 %v1080_v10, %v2602_v41  ;;  %v2034_v27 = vpop.f32.mrb[7].mxu0  ;;  %v1085_v29 = vrot.slane %v1080_v10, 6 }
 0x956   : > { %v1096_v28 = vrot.slane %v1094_v26, 6  ;;  %v1087_v30 = vadd.f32 %v1085_v29, %v2623_v0 }
 0x958   : > { %1097 = vrot.lane.b32.xlu1 %v1096_v28, %s2295_s16  ;;  %v1857_v2 = vmul.f32 -1.442695, %v1087_v30 }
 0x95a   : > { %2246 = vpow2.f32 %v1857_v2 }
 0x964   : > { %v2247_v31 = vpop.eup %2246 }
 0x965   : > { %v1091_v32 = vadd.f32 1.0, %v2247_v31 }
 0x967   : > { %2248 = vrcp.f32 %v1091_v32 }
 0x971   : > { %v2249_v33 = vpop.eup %2248 }
 0x972   : > { %v1107_v44 = vsub.f32 1.0, %v2249_v33  ;;  %v1115_v46 = vmul.f32 %v2249_v33, %v1113_v43 }
 0x9ca   : > { %v1098_v35 = vpop.permute.xlu1 %1097 }
 0x9cb   : > { %v1100_v7 = vmul.f32 %v2249_v33, %v1098_v35 }
 0x9cd   : > { %1102 = vrot.lane.b32.xlu0 %v1100_v7, %s2295_s16  ;;  %v1355_v7 = vld [vmem:[%s2778_s4] sm:$0xff] }
 0xa3f   : > { %v1103_v36 = vpop.permute.xlu0 %1102 }
 0xa40   : > { %v1105_v38 = vadd.f32 %v1103_v36, %v2623_v0  ;;  %v1356_v36 = vld [vmem:[%s2778_s4 + $0x8] sm:$0xff] }
 0xa42   : > { %2250 = vtanh.f32 %v1105_v38  ;;  %v2165_v38 = vpack.c.bf16 %v1356_v36, %v1355_v7 }
 0xa4c   : > { %v2251_v42 = vpop.eup %2250 }
 0xa4d   : > { %1109 = vrot.lane.b32.xlu1 %v2251_v42, %s2297_s20  ;;  %v1358_v42 = vld [vmem:[%s2778_s4 + $0x18] sm:$0xff] }
 0xabf   : > { %v1110_v45 = vpop.permute.xlu1 %1109 }
 0xac0   : > { %v1112_v47 = vmul.f32 %v1110_v45, %v1107_v44 }
 0xac2   : > { %v1116_v49 = vadd.f32 %v1115_v46, %v1112_v47 }
 0xac4   : > { %v1123_v52 = vrot.slane %v1116_v49, 2  ;;  %v1227_v15 = vrot.slane %v1116_v49, 6 }
 0xac6   : > { %1124 = vrot.lane.b32.xlu0 %v1123_v52, %s2297_s20 }
 0xb38   : > { %v1125_v54 = vpop.permute.xlu0 %1124 }
 0xb39   : > { %2044 = vmatmul.mubr.msk.f32.vlgmr.msra.gmra.mrb[4].mxu1 %vm902_vm5, %v1125_v54 }
 0xb3a   : > { %2065 = vmatprep.mubr.msk.f32.mxu1 %vm2292_vm3, %v2293_v37  ;;  %2166 = vmatpush3.bf16.msra.mxu1 %v2165_v38 }
 0xb3b   : > { %2167 = vmatprep.subr.bf16.mxu1 %v2291_v34 }
 0xc0c   : > { %v1194_v55 = vpop.f32.mrb[4].mxu1 }
 0xc0d   : > { %v1208_v56 = vadd.f32 %v1194_v55, %v2602_v41  ;;  %v2045_v57 = vpop.f32.mrb[5].mxu1  ;;  %v1199_v1 = vrot.slane %v1194_v55, 4 }
 0xc0e   : > { %v2687_v57 = vld [vmem:[%s2779_s5] sm:$0xff] }
 0xc0f   : > { %v1210_v58 = vrot.slane %v1208_v56, 4  ;;  %v1201_v60 = vadd.f32 %v1199_v1, %v2623_v0 }
 0xc11   : > { %1211 = vrot.lane.b32.xlu1 %v1210_v58, %s2295_s16  ;;  %v1859_v9 = vmul.f32 -1.442695, %v1201_v60  ;;  %v1362_v58 = vrot.slane %v2687_v57, %v2388_v8  ;;  %v1864_v8 = vld [vmem:[%s2778_s4 + $0x28] sm:$0xff] }
 0xc13   : > { %2252 = vpow2.f32 %v1859_v9 }
 0xc1d   : > { %v2253_v61 = vpop.eup %2252 }
 0xc1e   : > { %v1205_v62 = vadd.f32 1.0, %v2253_v61 }
 0xc20   : > { %2254 = vrcp.f32 %v1205_v62 }
 0xc2a   : > { %v2255_v63 = vpop.eup %2254 }
 0xc2b   : > { %v1221_v14 = vsub.f32 1.0, %v2255_v63  ;;  %v1229_v17 = vmul.f32 %v2255_v63, %v1227_v15  ;;  %v1866_v15 = vld [vmem:[%s2778_s4 + $0x38] sm:$0xff] }
 0xc83   : > { %v1212_v3 = vpop.permute.xlu1 %1211 }
 0xc84   : > { %v1214_v4 = vmul.f32 %v2255_v63, %v1212_v3 }
 0xc86   : > { %1216 = vrot.lane.b32.xlu0 %v1214_v4, %s2295_s16 }
 0xcf8   : > { %v1217_v11 = vpop.permute.xlu0 %1216 }
 0xcf9   : > { %v1219_v12 = vadd.f32 %v1217_v11, %v2623_v0 }
 0xcfb   : > { %2256 = vtanh.f32 %v1219_v12  ;;  %v1863_v12 = vld [vmem:[%s2778_s4 + $0x20] sm:$0xff] }
 0xd05   : > { %v2257_v13 = vpop.eup %2256 }
 0xd06   : > { %1223 = vrot.lane.b32.xlu1 %v2257_v13, %s2297_s20  ;;  %v2171_v13 = vpack.c.bf16 %v1864_v8, %v1863_v12 }
 0xd78   : > { %v1224_v16 = vpop.permute.xlu1 %1223 }
 0xd79   : > { %v1226_v18 = vmul.f32 %v1224_v16, %v1221_v14  ;;  %v1865_v14 = vld [vmem:[%s2778_s4 + $0x30] sm:$0xff] }
 0xd7a   : > { %v2174_v16 = vpack.c.bf16 %v1866_v15, %v1865_v14  ;;  %v1873_v15 = vld [vmem:[%s2779_s5 + $0x8] ss:$0 sm:$0xff] }
 0xd7b   : > { %v1230_v19 = vadd.f32 %v1229_v17, %v1226_v18 }
 0xd7d   : > { %v1237_v20 = vrot.slane %v1230_v19, 4  ;;  %v1341_v45 = vrot.slane %v1230_v19, 6 }
 0xd7f   : > { %1238 = vrot.lane.b32.xlu0 %v1237_v20, %s2297_s20  ;;  %v1453_v20 = vrot.slane %v2687_v57, %v2450_v50 }
 0xdf1   : > { %v1239_v21 = vpop.permute.xlu0 %1238 }
 0xdf2   : > { %2055 = vmatmul.mubr.msk.f32.vlgmr.msra.gmra.mrb[8].mxu0 %vm902_vm5, %v1239_v21 }
 0xdf3   : > { %2076 = vmatprep.mubr.msk.f32.mxu0 %vm2292_vm3, %v2293_v37  ;;  %2172 = vmatpush3.bf16.msra.mxu0 %v2171_v13  ;;  %v1665_v13 = vrot.slane %v2687_v57, %v720_v53 }
 0xdf4   : > { %2173 = vmatprep.subr.bf16.mxu0 %v2291_v34 }
 0xdf7   : > { %2175 = vmatpush3.bf16.msra.mxu0 %v2174_v16 }
 0xdf8   : > { %2182 = vmatprep.subr.bf16.mxu0 %v2291_v34 }
 0xec5   : > { %v1308_v22 = vpop.f32.mrb[8].mxu0 }
 0xec6   : > { %v1322_v23 = vadd.f32 %v1308_v22, %v2602_v41  ;;  %v2056_v24 = vpop.f32.mrb[9].mxu0  ;;  %v1313_v10 = vrot.slane %v1308_v22, 2  ;;  %v1458_v22 = vrot.slane %v2687_v57, %v480_v51 }
 0xec8   : > { %v1324_v25 = vrot.slane %v1322_v23, 2  ;;  %v1315_v26 = vadd.f32 %v1313_v10, %v2623_v0 }
 0xeca   : > { %1325 = vrot.lane.b32.xlu1 %v1324_v25, %s2295_s16  ;;  %v1861_v27 = vmul.f32 -1.442695, %v1315_v26  ;;  %v1469_v26 = vrot.slane %v2687_v57, %v494_v59  ;;  %v1869_v59 = vld [vmem:[%s2778_s4 + $0x48] sm:$0xff] }
 0xecc   : > { %2258 = vpow2.f32 %v1861_v27 }
 0xed6   : > { %v2259_v28 = vpop.eup %2258 }
 0xed7   : > { %v1319_v29 = vadd.f32 1.0, %v2259_v28 }
 0xed9   : > { %2260 = vrcp.f32 %v1319_v29 }
 0xee3   : > { %v2261_v30 = vpop.eup %2260 }
 0xee4   : > { %v1335_v44 = vsub.f32 1.0, %v2261_v30  ;;  %v1343_v47 = vmul.f32 %v2261_v30, %v1341_v45 }
 0xf3c   : > { %v1326_v2 = vpop.permute.xlu1 %1325 }
 0xf3d   : > { %v1328_v31 = vmul.f32 %v2261_v30, %v1326_v2 }
 0xf3f   : > { %1330 = vrot.lane.b32.xlu0 %v1328_v31, %s2295_s16 }
 0xf43   : > { %1118 = vrot.lane.b32.xlu0 %v1116_v49, %s2297_s20 }
 0xfb1   : > { %v1331_v41 = vpop.permute.xlu0 %1330 }
 0xfb2   : > { %v1333_v32 = vadd.f32 %v1331_v41, %v2623_v0  ;;  %v1357_v0 = vld [vmem:[%s2778_s4 + $0x10] sm:$0xff] }
 0xfb3   : > { %v2168_v43 = vpack.c.bf16 %v1358_v42, %v1357_v0  ;;  %v1559_v42 = vrot.slane %v2687_v57, %v597_v39 }
 0xfb4   : > { %2262 = vtanh.f32 %v1333_v32 }
 0xfb5   : > { %v1119_v33 = vpop.permute.xlu0 %1118  ;;  %2169 = vmatpush3.bf16.msra.mxu1 %v2168_v43 }
 0xfb6   : > { %1122 = vst.msk [vmem:[#allocation3] sm:$0xc] %vm1121_vm7, %v1119_v33  ;;  %2176 = vmatprep.subr.bf16.mxu1 %v2291_v34  ;;  %v1870_v33 = vld [vmem:[%s2778_s4 + $0x50] sm:$0xff] }
 0xfbe   : > { %v2263_v35 = vpop.eup %2262 }
 0xfbf   : > { %1337 = vrot.lane.b32.xlu1 %v2263_v35, %s2297_s20  ;;  %v1871_v35 = vld [vmem:[%s2778_s4 + $0x58] sm:$0xff] }
 0xfc0   : > { %v2180_v7 = vpack.c.bf16 %v1871_v35, %v1870_v33 }
 0xfc3   : > { %1232 = vrot.lane.b32.xlu1 %v1230_v19, %s2297_s20 }
0x1031   : > { %v1338_v46 = vpop.permute.xlu1 %1337 }
0x1032   : > { %v1340_v49 = vmul.f32 %v1338_v46, %v1335_v44  ;;  %v1564_v44 = vrot.slane %v2687_v57, %v602_v40 }
0x1034   : > { %v1344_v52 = vadd.f32 %v1343_v47, %v1340_v49 }
0x1035   : > { %v1233_v54 = vpop.permute.xlu1 %1232 }
0x1036   : > { %1236 = vst.msk [vmem:[#allocation3] sm:$0x30] %vm1235_vm8, %v1233_v54  ;;  %1346 = vrot.lane.b32.xlu0 %v1344_v52, %s2297_s20  ;;  %v1575_v52 = vrot.slane %v2687_v57, %v617_v48  ;;  %v1674_v48 = vld [vmem:[%s2784_s10 + $0x8] sm:$0xff] }
0x10a8   : > { %v1347_v55 = vpop.permute.xlu0 %1346 }
0x10a9   : > { %1350 = vst.msk [vmem:[#allocation3] sm:$0xc0] %vm1349_vm9, %v1347_v55  ;;  %1351 = vst.msk [vmem:[#allocation2 - $0x6] sm:$0xc0] %vm1349_vm9, %v1347_v55 }
0x10b0   : > { %v1354_v56 = vld [vmem:[#allocation3] sm:$0xff] }
0x10b1   : > { %2066 = vmatmul.mubr.msk.f32.vlgmr.msra.gmra.mrb[6].mxu1 %vm902_vm5, %v1354_v56 }
0x10b2   : > { %2087 = vmatprep.mubr.msk.f32.mxu1 %vm2292_vm3, %v2293_v37 }
0x1184   : > { %v1432_v1 = vpop.f32.mrb[6].mxu1 }
0x1185   : > { %v1433_v60 = vadd.f32 %v1432_v1, %v1362_v58  ;;  %v2067_v9 = vpop.f32.mrb[7].mxu1 }
0x1187   : > { %v1436_v61 = vsel %vm902_vm5, %v1433_v60, 0.0 }
0x1188   : > { %1437 = vadd.xlane.f32.xlu1 %v1436_v61  ;;  %v1673_v61 = vld [vmem:[%s2784_s10] sm:$0xff] }
0x1215   : > { %v1438_v62 = vpop.xlane.xlu1 %1437 }
0x1216   : > { %v1440_v63 = vmul.f32 0.03125, %v1438_v62  ;;  %v2183_v62 = vpack.c.bf16 %v1674_v48, %v1673_v61 }
0x1218   : > { %v1441_v3 = vsub.f32 %v1433_v60, %v1440_v63  ;;  %v1675_v63 = vld [vmem:[%s2784_s10 + $0x10] sm:$0xff] }
0x121a   : > { %v1442_v4 = vmul.f32 %v1441_v3, %v1441_v3 }
0x121c   : > { %v1443_v11 = vsel %vm902_vm5, %v1442_v4, 0.0 }
0x121d   : > { %1444 = vadd.xlane.f32.xlu0 %v1443_v11 }
0x12aa   : > { %v1445_v17 = vpop.xlane.xlu0 %1444 }
0x12ab   : > { %v1446_v18 = vmul.f32 0.03125, %v1445_v17 }
0x12ad   : > { %v1447_v19 = vadd.f32 1e-05, %v1446_v18 }
0x12af   : > { %2264 = vrsqrt.f32 %v1447_v19  ;;  %v1874_v19 = vld [vmem:[%s2785_s11] ss:$0 sm:$0xff] }
0x12b9   : > { %v2265_v21 = vpop.eup %2264 }
0x12ba   : > { %v1449_v23 = vmul.f32 %v2265_v21, %v1441_v3  ;;  %v1676_v3 = vld [vmem:[%s2784_s10 + $0x18] sm:$0xff] }
0x12bb   : > { %v2186_v4 = vpack.c.bf16 %v1676_v3, %v1675_v63 }
0x12bc   : > { %v1454_v24 = vmul.f32 %v1453_v20, %v1449_v23 }
0x12be   : > { %v1459_v25 = vadd.f32 %v1458_v22, %v1454_v24 }
0x12c0   : > { %v1460_v10 = vmax.f32 %v1459_v25, 0.0 }
0x12c2   : > { %2077 = vmatmul.mubr.msk.f32.vlgmr.msra.gmra.mrb[10].mxu0 %vm902_vm5, %v1460_v10 }
0x12c3   : > { %2098 = vmatprep.mubr.msk.f32.mxu0 %vm2292_vm3, %v2293_v37  ;;  %v1868_v37 = vld [vmem:[%s2778_s4 + $0x40] sm:$0xff]  ;;  %2184 = vmatpush3.bf16.msra.mxu0 %v2183_v62 }
0x12c4   : > { %v2177_v32 = vpack.c.bf16 %v1869_v59, %v1868_v37  ;;  %2185 = vmatprep.subr.bf16.mxu0 %v2291_v34 }
0x12c6   : > { %2178 = vmatpush3.bf16.msra.mxu1 %v2177_v32 }
0x12c7   : > { %2179 = vmatprep.subr.bf16.mxu1 %v2291_v34  ;;  %2187 = vmatpush3.bf16.msra.mxu0 %v2186_v4 }
0x12ca   : > { %2181 = vmatpush3.bf16.msra.mxu1 %v2180_v7 }
0x1395   : > { %v1539_v27 = vpop.f32.mrb[10].mxu0 }
0x1396   : > { %v1540_v50 = vadd.f32 %v1539_v27, %v1469_v26  ;;  %v2078_v28 = vpop.f32.mrb[11].mxu0 }
0x1398   : > { %v1543_v29 = vsel %vm902_vm5, %v1540_v50, 0.0 }
0x1399   : > { %1544 = vadd.xlane.f32.xlu0 %v1543_v29 }
0x1426   : > { %v1545_v51 = vpop.xlane.xlu0 %1544 }
0x1427   : > { %v1546_v30 = vmul.f32 0.03125, %v1545_v51 }
0x1429   : > { %v1547_v2 = vsub.f32 %v1540_v50, %v1546_v30 }
0x142b   : > { %v1548_v31 = vmul.f32 %v1547_v2, %v1547_v2 }
0x142d   : > { %v1549_v41 = vsel %vm902_vm5, %v1548_v31, 0.0 }
0x142e   : > { %1550 = vadd.xlane.f32.xlu1 %v1549_v41 }
0x14bb   : > { %v1551_v36 = vpop.xlane.xlu1 %1550 }
0x14bc   : > { %v1552_v38 = vmul.f32 0.03125, %v1551_v36 }
0x14be   : > { %v1553_v0 = vadd.f32 1e-05, %v1552_v38 }
0x14c0   : > { %2266 = vrsqrt.f32 %v1553_v0 }
0x14ca   : > { %v2267_v43 = vpop.eup %2266 }
0x14cb   : > { %v1555_v45 = vmul.f32 %v2267_v43, %v1547_v2 }
0x14cd   : > { %v1560_v46 = vmul.f32 %v1559_v42, %v1555_v45 }
0x14cf   : > { %v1565_v47 = vadd.f32 %v1564_v44, %v1560_v46 }
0x14d1   : > { %v1566_v49 = vmax.f32 %v1565_v47, 0.0 }
0x14d3   : > { %2088 = vmatmul.mubr.msk.f32.vlgmr.msra.gmra.mrb[8].mxu1 %vm902_vm5, %v1566_v49 }
0x15a6   : > { %v1645_v54 = vpop.f32.mrb[8].mxu1 }
0x15a7   : > { %v1646_v55 = vadd.f32 %v1645_v54, %v1575_v52  ;;  %v2089_v56 = vpop.f32.mrb[9].mxu1 }
0x15a9   : > { %v1649_v39 = vsel %vm902_vm5, %v1646_v55, 0.0 }
0x15aa   : > { %1650 = vadd.xlane.f32.xlu0 %v1649_v39 }
0x1637   : > { %v1651_v58 = vpop.xlane.xlu0 %1650 }
0x1638   : > { %v1652_v1 = vmul.f32 0.03125, %v1651_v58 }
0x163a   : > { %v1653_v60 = vsub.f32 %v1646_v55, %v1652_v1 }
0x163c   : > { %v1654_v40 = vmul.f32 %v1653_v60, %v1653_v60 }
0x163e   : > { %v1655_v9 = vsel %vm902_vm5, %v1654_v40, 0.0 }
0x163f   : > { %1656 = vadd.xlane.f32.xlu1 %v1655_v9 }
0x16cc   : > { %v1657_v11 = vpop.xlane.xlu1 %1656 }
0x16cd   : > { %v1658_v12 = vmul.f32 0.03125, %v1657_v11 }
0x16cf   : > { %v1659_v8 = vadd.f32 1e-05, %v1658_v12 }
0x16d1   : > { %2268 = vrsqrt.f32 %v1659_v8 }
0x16db   : > { %v2269_v14 = vpop.eup %2268 }
0x16dc   : > { %v1661_v34 = vmul.f32 %v2269_v14, %v1653_v60 }
0x16de   : > { %v1666_v16 = vmul.f32 %v1665_v13, %v1661_v34 }
0x16e0   : > { %v1671_v17 = vadd.f32 %v1873_v15, %v1666_v16 }
0x16e2   : > { %v1672_v18 = vmax.f32 %v1671_v17, 0.0 }
0x16e4   : > { %2099 = vmatmul.mubr.msk.f32.vlgmr.msra.gmra.mrb[12].mxu0 %vm902_vm5, %v1672_v18 }
0x17b7   : > { %v1753_v20 = vpop.f32.mrb[12].mxu0 }
0x17b8   : > { %v1754_v21 = vadd.f32 %v1874_v19, %v1753_v20  ;;  %v2100_v5 = vpop.f32.mrb[13].mxu0 }
0x17ba   : > { %v1876_v22 = vmul.f32 -1.442695, %v1754_v21 }
0x17bc   : > { %2270 = vpow2.f32 %v1876_v22 }
0x17c6   : > { %v2271_v53 = vpop.eup %2270 }
0x17c7   : > { %v1760_v57 = vadd.f32 1.0, %v2271_v53 }
0x17c9   : > { %2272 = vrcp.f32 %v1760_v57 }
0x17d3   : > { %v2273_v23 = vpop.eup %2272 }
0x17d4   : > { %v2192_v24 = vand.u32 2147483647, %v2273_v23  ;;  %vm2196_vm10 = vcmp.lt.f32.partialorder %v2273_v23, 0  ;;  %vm2197_vm11 = vcmp.eq.f32.partialorder %v2273_v23, 0  ;;  %vm2209_vm13 = vcmp.ne.f32.partialorder %v2273_v23, %v2273_v23 }
0x17d5   : > { %vm2198_vm14 = vcmp.eq.f32.partialorder %v2273_v23, 1065353216 }
0x17d6   : > { %2274 = vlog2.f32 %v2192_v24  ;;  %vm2201_vm12 = vcmp.eq.f32.partialorder %v2192_v24, 2139095040 }
0x17e0   : > { %v2275_v25 = vpop.eup %2274 }
0x17e1   : > { %v2194_v10 = vmul.f32 2.3025851, %v2275_v25 }
0x17e3   : > { %2276 = vpow2.f32 %v2194_v10 }
0x17ed   : > { %v2277_v26 = vpop.eup %2276 }
0x17ee   : > { %v2202_v27 = vsel %vm2196_vm10, 2143289344, %v2277_v26 }
0x17ef   : > { %v2203_v50 = vsel %vm2197_vm11, 0, %v2202_v27 }
0x17f0   : > { %v2208_v28 = vsel %vm2201_vm12, 2139095040, %v2203_v50 }
0x17f1   : > { %v2212_v29 = vsel %vm2209_vm13, 2143289344, %v2208_v28 }
0x17f2   : > { %v2213_v51 = vsel %vm2198_vm14, 1065353216, %v2212_v29 }
0x17f3   : > { %v1764_v30 = vmul.f32 2.0, %v2213_v51 }
0x17f5   : > { %v1765_v2 = vadd.f32 1e-07, %v1764_v30 }
0x17f7   : > { %v1769_v31 = vsel %vm1768_vm1, %v1765_v2, 0.0 }
0x17f8   : > { %1770 = vadd.xlane.f32.xlu0 %v1769_v31 }
0x1885   : > { %v1771_v41 = vpop.xlane.xlu0 %1770 }
0x1886   : > { %2278 = vrcp.f32 %v1771_v41 }
0x1890   : > { %v2279_v37 = vpop.eup %2278 }
0x1891   : > { %v1773_v59 = vmul.f32 %v2279_v37, %v1771_v41 }
0x1893   : > { %v1774_v32 = vsub.f32 2.0, %v1773_v59 }
0x1895   : > { %v1775_v33 = vmul.f32 %v2279_v37, %v1774_v32 }
0x1897   : > { %v1776_v35 = vmul.f32 %v1775_v33, %v1765_v2 }
0x1899   : > { %v1777_v7 = vsel %vm1768_vm1, %v1776_v35, %v1765_v2 }
0x189a   : > { %1778 = vst [vmem:[%s2377_s30] sm:$0xff] %v1777_v7 }
0x189b PF: > { %s22_s21 = sadd.s32 1, %s2286_s21  }
0x189c   : > { %p19_p5 = scmp.ge.s32.totalorder %s22_s21, 4  }
0x189e   :  { %21 = sbr.rel (!%p19_p5) target bundleno = 1 (0x1), region = 105 }

</bundles_post_ra>
